<compile_context>
chip_gen: v7x
topology: tpu7x:2x2x1
jax: 0.10.0
libtpu: 0.0.40
codegen_flags: <defaults>
</compile_context>

<pallas_src>
import functools

import jax
import jax.numpy as jnp
from jax.experimental import pallas as pl
from jax.experimental.pallas import tpu as pltpu


def _round_up(n, m):
    return ((n + m - 1) // m) * m


def _pad2(a, rows, cols):
    return jnp.pad(a, ((0, rows - a.shape[0]), (0, cols - a.shape[1])))


def _make_kernel(latent, d_out, label_dim):
    """latent / d_out are LOGICAL (unpadded) feature widths."""

    def time_relu(h, wt, bt, wa, ba):
        # TimeReLU(time_shape=2, leaky=True): time = last 2 logical columns of h.
        times = h[:, latent - 2:latent]                              # [TB, 2]
        thr = jnp.dot(times, wt, preferred_element_type=jnp.float32) + bt
        alp = jnp.dot(times, wa, preferred_element_type=jnp.float32) + ba
        return jnp.where(h > thr, h, alp * h + thr)

    def kernel(x_ref,
               w0_ref, b0_ref, wt0_ref, bt0_ref, wa0_ref, ba0_ref,
               w00_ref, b00_ref, wt1_ref, bt1_ref, wa1_ref, ba1_ref,
               w01_ref, b01_ref, wt2_ref, bt2_ref, wa2_ref, ba2_ref,
               w1_ref, b1_ref,
               o_ref):
        mm = w0_ref.dtype                      # matmul operand dtype (f32 / bf16)
        x = x_ref[...]

        h = jnp.dot(x.astype(mm), w0_ref[...],
                    preferred_element_type=jnp.float32) + b0_ref[...]
        h = time_relu(h, wt0_ref[...], bt0_ref[...], wa0_ref[...], ba0_ref[...])

        h = jnp.dot(h.astype(mm), w00_ref[...],
                    preferred_element_type=jnp.float32) + b00_ref[...]
        h = time_relu(h, wt1_ref[...], bt1_ref[...], wa1_ref[...], ba1_ref[...])

        h = jnp.dot(h.astype(mm), w01_ref[...],
                    preferred_element_type=jnp.float32) + b01_ref[...]
        h = time_relu(h, wt2_ref[...], bt2_ref[...], wa2_ref[...], ba2_ref[...])

        out = jnp.dot(h.astype(mm), w1_ref[...],
                      preferred_element_type=jnp.float32) + b1_ref[...]

        if label_dim:
            # lab = sigmoid(last logical column); append it as column d_out.
            lab = jax.nn.sigmoid(out[:, d_out - 1:d_out])            # [TB, 1]
            col = jax.lax.broadcasted_iota(jnp.int32, out.shape, 1)
            out = jnp.where(col == d_out, lab, out)

        o_ref[...] = out.astype(o_ref.dtype)

    return kernel


def transformer_pallas(x, params, *, data_shape, latent_shape, label_dim=0,
                       batch_tile=512, matmul_dtype=jnp.float32):
    (w0, b0, wt0, bt0, wa0, ba0,
     w00, b00, wt1, bt1, wa1, ba1,
     w01, b01, wt2, bt2, wa2, ba2,
     w1, b1) = params

    B = x.shape[0]
    D, L = data_shape, latent_shape
    d_out = D - 2
    d_final = d_out + (1 if label_dim else 0)

    # Lane-dense padding of every feature axis to a multiple of 128.
    Dp = _round_up(D, 128)
    Lp = _round_up(L, 128)
    Op = _round_up(d_final, 128)

    # Batch tile: multiple of 8 sublanes; pad the batch to a multiple of it.
    tb = max(8, min(_round_up(batch_tile, 8), _round_up(B, 8)))
    Bp = _round_up(B, tb)
    grid = (Bp // tb,)

    f32 = jnp.float32
    mm = matmul_dtype
    x_p = _pad2(x.astype(f32), Bp, Dp)

    inputs = [
        x_p,
        _pad2(w0, Dp, Lp).astype(mm),  _pad2(b0, 1, Lp).astype(f32),
        _pad2(wt0, 2, Lp).astype(f32), _pad2(bt0, 1, Lp).astype(f32),
        _pad2(wa0, 2, Lp).astype(f32), _pad2(ba0, 1, Lp).astype(f32),
        _pad2(w00, Lp, Lp).astype(mm), _pad2(b00, 1, Lp).astype(f32),
        _pad2(wt1, 2, Lp).astype(f32), _pad2(bt1, 1, Lp).astype(f32),
        _pad2(wa1, 2, Lp).astype(f32), _pad2(ba1, 1, Lp).astype(f32),
        _pad2(w01, Lp, Lp).astype(mm), _pad2(b01, 1, Lp).astype(f32),
        _pad2(wt2, 2, Lp).astype(f32), _pad2(bt2, 1, Lp).astype(f32),
        _pad2(wa2, 2, Lp).astype(f32), _pad2(ba2, 1, Lp).astype(f32),
        _pad2(w1, Lp, Op).astype(mm),  _pad2(b1, 1, Op).astype(f32),
    ]

    def batch_spec(feat):
        return pl.BlockSpec((tb, feat), lambda i: (i, 0))

    def pinned(shape):
        # Constant index_map -> weight block stays resident, no re-DMA per step.
        return pl.BlockSpec(shape, lambda i: (0, 0))

    in_specs = [batch_spec(Dp)] + [pinned(a.shape) for a in inputs[1:]]
    out_specs = batch_spec(Op)

    flops = 2 * Bp * (Dp * Lp + 2 * Lp * Lp + Lp * Op)
    bytes_accessed = (sum(int(a.size) * a.dtype.itemsize for a in inputs)
                      + Bp * Op * 4)
    cost = pl.CostEstimate(flops=flops,
                           transcendentals=Bp if label_dim else 0,
                           bytes_accessed=bytes_accessed)

    kernel = _make_kernel(L, d_out, label_dim)

    out = pl.pallas_call(
        kernel,
        out_shape=jax.ShapeDtypeStruct((Bp, Op), jnp.float32),
        grid=grid,
        in_specs=in_specs,
        out_specs=out_specs,
        compiler_params=pltpu.CompilerParams(
            dimension_semantics=("parallel",),
            vmem_limit_bytes=32 * 1024 * 1024),
        cost_estimate=cost,
    )(*inputs)

    return out[:B, :d_final]


def transformer_ref(x, params, label_dim=0):
    """Pure-JAX reference matching the PyTorch Transformer.forward."""
    (w0, b0, wt0, bt0, wa0, ba0,
     w00, b00, wt1, bt1, wa1, ba1,
     w01, b01, wt2, bt2, wa2, ba2,
     w1, b1) = params

    def trelu(h, wt, bt, wa, ba):
        t = h[:, -2:]
        thr = t @ wt + bt
        alp = t @ wa + ba
        return jnp.where(h > thr, h, alp * h + thr)

    h = trelu(x @ w0 + b0, wt0, bt0, wa0, ba0)
    h = trelu(h @ w00 + b00, wt1, bt1, wa1, ba1)
    h = trelu(h @ w01 + b01, wt2, bt2, wa2, ba2)
    o = h @ w1 + b1
    if label_dim:
        lab = jax.nn.sigmoid(o[:, -1:])
        o = jnp.concatenate([o, lab], axis=1)
    return o


def init_params(key, data_shape, latent_shape):
    """Deterministic synthetic init mirroring nn.Linear U(-1/sqrt(in), 1/sqrt(in)).
    Weights are stored pre-transposed as [in_features, out_features]."""
    keys = iter(jax.random.split(key, 20))

    def linear(in_f, out_f):
        lim = 1.0 / (in_f ** 0.5)
        w = jax.random.uniform(next(keys), (in_f, out_f), jnp.float32, -lim, lim)
        b = jax.random.uniform(next(keys), (1, out_f), jnp.float32, -lim, lim)
        return [w, b]

    p = []
    p += linear(data_shape, latent_shape)       # layer_0
    p += linear(2, latent_shape)                # leaky_relu_0.model
    p += linear(2, latent_shape)                # leaky_relu_0.model_alpha
    p += linear(latent_shape, latent_shape)     # layer_0_0
    p += linear(2, latent_shape)                # leaky_relu_0_0.model
    p += linear(2, latent_shape)                # leaky_relu_0_0.model_alpha
    p += linear(latent_shape, latent_shape)     # layer_0_1
    p += linear(2, latent_shape)                # leaky_relu_0_1.model
    p += linear(2, latent_shape)                # leaky_relu_0_1.model_alpha
    p += linear(latent_shape, data_shape - 2)   # layer_1
    return tuple(p)


if __name__ == "__main__":
    B = 256
    DATA = 32        # data_shape
    LATENT = 64      # latent_shape
    LABEL_DIM = 1    # exercise the sigmoid/concat tail as well

    key = jax.random.PRNGKey(0)
    kx, kp = jax.random.split(key)
    x = jax.random.normal(kx, (B, DATA), jnp.float32)
    params = init_params(kp, DATA, LATENT)

    fwd = functools.partial(
        transformer_pallas, data_shape=DATA, latent_shape=LATENT,
        label_dim=LABEL_DIM, batch_tile=128, matmul_dtype=jnp.float32)

    y = jax.block_until_ready(fwd(x, params))
    y_ref = transformer_ref(x, params, label_dim=LABEL_DIM)

    assert y.shape == (B, DATA - 2 + (1 if LABEL_DIM else 0)), y.shape
    assert jnp.allclose(y, y_ref, atol=1e-4, rtol=1e-4), \
        float(jnp.max(jnp.abs(y - y_ref)))
    print("KERNEL_OK")
</pallas_src>

<mosaic_0001>
module attributes {stable_mosaic.version = 11 : i64} {
  func.func @kernel(%arg0: i32, %arg1: memref<128x128xf32, #tpu.memory_space<vmem>>, %arg2: memref<128x128xf32, #tpu.memory_space<vmem>>, %arg3: memref<1x128xf32, #tpu.memory_space<vmem>>, %arg4: memref<2x128xf32, #tpu.memory_space<vmem>>, %arg5: memref<1x128xf32, #tpu.memory_space<vmem>>, %arg6: memref<2x128xf32, #tpu.memory_space<vmem>>, %arg7: memref<1x128xf32, #tpu.memory_space<vmem>>, %arg8: memref<128x128xf32, #tpu.memory_space<vmem>>, %arg9: memref<1x128xf32, #tpu.memory_space<vmem>>, %arg10: memref<2x128xf32, #tpu.memory_space<vmem>>, %arg11: memref<1x128xf32, #tpu.memory_space<vmem>>, %arg12: memref<2x128xf32, #tpu.memory_space<vmem>>, %arg13: memref<1x128xf32, #tpu.memory_space<vmem>>, %arg14: memref<128x128xf32, #tpu.memory_space<vmem>>, %arg15: memref<1x128xf32, #tpu.memory_space<vmem>>, %arg16: memref<2x128xf32, #tpu.memory_space<vmem>>, %arg17: memref<1x128xf32, #tpu.memory_space<vmem>>, %arg18: memref<2x128xf32, #tpu.memory_space<vmem>>, %arg19: memref<1x128xf32, #tpu.memory_space<vmem>>, %arg20: memref<128x128xf32, #tpu.memory_space<vmem>>, %arg21: memref<1x128xf32, #tpu.memory_space<vmem>>, %arg22: memref<128x128xf32, #tpu.memory_space<vmem>>) attributes {dimension_semantics = [#tpu.dimension_semantics<parallel>], iteration_bounds = array<i64: 2>, scalar_prefetch = 0 : i64, scratch_operands = 0 : i64, tpu.core_type = #tpu.core_type<tc>, window_params = [{transform_indices = @transform_0, window_bounds = array<i64: 128, 128>}, {pipeline_mode = #tpu.pipeline_mode<synchronous>, transform_indices = @transform_1, window_bounds = array<i64: 128, 128>}, {pipeline_mode = #tpu.pipeline_mode<synchronous>, transform_indices = @transform_2, window_bounds = array<i64: 1, 128>}, {pipeline_mode = #tpu.pipeline_mode<synchronous>, transform_indices = @transform_3, window_bounds = array<i64: 2, 128>}, {pipeline_mode = #tpu.pipeline_mode<synchronous>, transform_indices = @transform_4, window_bounds = array<i64: 1, 128>}, {pipeline_mode = #tpu.pipeline_mode<synchronous>, transform_indices = @transform_5, window_bounds = array<i64: 2, 128>}, {pipeline_mode = #tpu.pipeline_mode<synchronous>, transform_indices = @transform_6, window_bounds = array<i64: 1, 128>}, {pipeline_mode = #tpu.pipeline_mode<synchronous>, transform_indices = @transform_7, window_bounds = array<i64: 128, 128>}, {pipeline_mode = #tpu.pipeline_mode<synchronous>, transform_indices = @transform_8, window_bounds = array<i64: 1, 128>}, {pipeline_mode = #tpu.pipeline_mode<synchronous>, transform_indices = @transform_9, window_bounds = array<i64: 2, 128>}, {pipeline_mode = #tpu.pipeline_mode<synchronous>, transform_indices = @transform_10, window_bounds = array<i64: 1, 128>}, {pipeline_mode = #tpu.pipeline_mode<synchronous>, transform_indices = @transform_11, window_bounds = array<i64: 2, 128>}, {pipeline_mode = #tpu.pipeline_mode<synchronous>, transform_indices = @transform_12, window_bounds = array<i64: 1, 128>}, {pipeline_mode = #tpu.pipeline_mode<synchronous>, transform_indices = @transform_13, window_bounds = array<i64: 128, 128>}, {pipeline_mode = #tpu.pipeline_mode<synchronous>, transform_indices = @transform_14, window_bounds = array<i64: 1, 128>}, {pipeline_mode = #tpu.pipeline_mode<synchronous>, transform_indices = @transform_15, window_bounds = array<i64: 2, 128>}, {pipeline_mode = #tpu.pipeline_mode<synchronous>, transform_indices = @transform_16, window_bounds = array<i64: 1, 128>}, {pipeline_mode = #tpu.pipeline_mode<synchronous>, transform_indices = @transform_17, window_bounds = array<i64: 2, 128>}, {pipeline_mode = #tpu.pipeline_mode<synchronous>, transform_indices = @transform_18, window_bounds = array<i64: 1, 128>}, {pipeline_mode = #tpu.pipeline_mode<synchronous>, transform_indices = @transform_19, window_bounds = array<i64: 128, 128>}, {pipeline_mode = #tpu.pipeline_mode<synchronous>, transform_indices = @transform_20, window_bounds = array<i64: 1, 128>}, {transform_indices = @transform_21, window_bounds = array<i64: 128, 128>}]} {
    %c0 = arith.constant 0 : index
    %c0_0 = arith.constant 0 : index
    %0 = vector.load %arg1[%c0, %c0_0] : memref<128x128xf32, #tpu.memory_space<vmem>>, vector<128x128xf32>
    %c0_1 = arith.constant 0 : index
    %c0_2 = arith.constant 0 : index
    %1 = vector.load %arg2[%c0_1, %c0_2] : memref<128x128xf32, #tpu.memory_space<vmem>>, vector<128x128xf32>
    %cst = arith.constant dense<0.000000e+00> : vector<128x128xf32>
    %2 = tpu.matmul %0, %1, %cst {dimension_numbers = #tpu.dot_dimension_numbers<[1], [0], [0], [1], [0, 0, 1, 1], [], []>} : vector<128x128xf32>, vector<128x128xf32>, vector<128x128xf32> -> vector<128x128xf32>
    %c0_3 = arith.constant 0 : index
    %c0_4 = arith.constant 0 : index
    %3 = vector.load %arg3[%c0_3, %c0_4] : memref<1x128xf32, #tpu.memory_space<vmem>>, vector<1x128xf32>
    %4 = vector.broadcast %3 : vector<1x128xf32> to vector<128x128xf32>
    %5 = arith.addf %2, %4 : vector<128x128xf32>
    %c0_5 = arith.constant 0 : index
    %c0_6 = arith.constant 0 : index
    %6 = vector.load %arg4[%c0_5, %c0_6] : memref<2x128xf32, #tpu.memory_space<vmem>>, vector<2x128xf32>
    %c0_7 = arith.constant 0 : index
    %c0_8 = arith.constant 0 : index
    %7 = vector.load %arg5[%c0_7, %c0_8] : memref<1x128xf32, #tpu.memory_space<vmem>>, vector<1x128xf32>
    %c0_9 = arith.constant 0 : index
    %c0_10 = arith.constant 0 : index
    %8 = vector.load %arg6[%c0_9, %c0_10] : memref<2x128xf32, #tpu.memory_space<vmem>>, vector<2x128xf32>
    %c0_11 = arith.constant 0 : index
    %c0_12 = arith.constant 0 : index
    %9 = vector.load %arg7[%c0_11, %c0_12] : memref<1x128xf32, #tpu.memory_space<vmem>>, vector<1x128xf32>
    %10 = vector.extract_strided_slice %5 {offsets = [0, 62], sizes = [128, 2], strides = [1, 1]} : vector<128x128xf32> to vector<128x2xf32>
    %cst_13 = arith.constant dense<0.000000e+00> : vector<128x128xf32>
    %11 = tpu.matmul %10, %6, %cst_13 {dimension_numbers = #tpu.dot_dimension_numbers<[1], [0], [0], [1], [0, 0, 1, 1], [], []>} : vector<128x2xf32>, vector<2x128xf32>, vector<128x128xf32> -> vector<128x128xf32>
    %12 = vector.broadcast %7 : vector<1x128xf32> to vector<128x128xf32>
    %13 = arith.addf %11, %12 : vector<128x128xf32>
    %cst_14 = arith.constant dense<0.000000e+00> : vector<128x128xf32>
    %14 = tpu.matmul %10, %8, %cst_14 {dimension_numbers = #tpu.dot_dimension_numbers<[1], [0], [0], [1], [0, 0, 1, 1], [], []>} : vector<128x2xf32>, vector<2x128xf32>, vector<128x128xf32> -> vector<128x128xf32>
    %15 = vector.broadcast %9 : vector<1x128xf32> to vector<128x128xf32>
    %16 = arith.addf %14, %15 : vector<128x128xf32>
    %17 = arith.cmpf ogt, %5, %13 : vector<128x128xf32>
    %18 = arith.mulf %16, %5 : vector<128x128xf32>
    %19 = arith.addf %18, %13 : vector<128x128xf32>
    %20 = arith.select %17, %5, %19 : vector<128x128xi1>, vector<128x128xf32>
    %c0_15 = arith.constant 0 : index
    %c0_16 = arith.constant 0 : index
    %21 = vector.load %arg8[%c0_15, %c0_16] : memref<128x128xf32, #tpu.memory_space<vmem>>, vector<128x128xf32>
    %cst_17 = arith.constant dense<0.000000e+00> : vector<128x128xf32>
    %22 = tpu.matmul %20, %21, %cst_17 {dimension_numbers = #tpu.dot_dimension_numbers<[1], [0], [0], [1], [0, 0, 1, 1], [], []>} : vector<128x128xf32>, vector<128x128xf32>, vector<128x128xf32> -> vector<128x128xf32>
    %c0_18 = arith.constant 0 : index
    %c0_19 = arith.constant 0 : index
    %23 = vector.load %arg9[%c0_18, %c0_19] : memref<1x128xf32, #tpu.memory_space<vmem>>, vector<1x128xf32>
    %24 = vector.broadcast %23 : vector<1x128xf32> to vector<128x128xf32>
    %25 = arith.addf %22, %24 : vector<128x128xf32>
    %c0_20 = arith.constant 0 : index
    %c0_21 = arith.constant 0 : index
    %26 = vector.load %arg10[%c0_20, %c0_21] : memref<2x128xf32, #tpu.memory_space<vmem>>, vector<2x128xf32>
    %c0_22 = arith.constant 0 : index
    %c0_23 = arith.constant 0 : index
    %27 = vector.load %arg11[%c0_22, %c0_23] : memref<1x128xf32, #tpu.memory_space<vmem>>, vector<1x128xf32>
    %c0_24 = arith.constant 0 : index
    %c0_25 = arith.constant 0 : index
    %28 = vector.load %arg12[%c0_24, %c0_25] : memref<2x128xf32, #tpu.memory_space<vmem>>, vector<2x128xf32>
    %c0_26 = arith.constant 0 : index
    %c0_27 = arith.constant 0 : index
    %29 = vector.load %arg13[%c0_26, %c0_27] : memref<1x128xf32, #tpu.memory_space<vmem>>, vector<1x128xf32>
    %30 = vector.extract_strided_slice %25 {offsets = [0, 62], sizes = [128, 2], strides = [1, 1]} : vector<128x128xf32> to vector<128x2xf32>
    %cst_28 = arith.constant dense<0.000000e+00> : vector<128x128xf32>
    %31 = tpu.matmul %30, %26, %cst_28 {dimension_numbers = #tpu.dot_dimension_numbers<[1], [0], [0], [1], [0, 0, 1, 1], [], []>} : vector<128x2xf32>, vector<2x128xf32>, vector<128x128xf32> -> vector<128x128xf32>
    %32 = vector.broadcast %27 : vector<1x128xf32> to vector<128x128xf32>
    %33 = arith.addf %31, %32 : vector<128x128xf32>
    %cst_29 = arith.constant dense<0.000000e+00> : vector<128x128xf32>
    %34 = tpu.matmul %30, %28, %cst_29 {dimension_numbers = #tpu.dot_dimension_numbers<[1], [0], [0], [1], [0, 0, 1, 1], [], []>} : vector<128x2xf32>, vector<2x128xf32>, vector<128x128xf32> -> vector<128x128xf32>
    %35 = vector.broadcast %29 : vector<1x128xf32> to vector<128x128xf32>
    %36 = arith.addf %34, %35 : vector<128x128xf32>
    %37 = arith.cmpf ogt, %25, %33 : vector<128x128xf32>
    %38 = arith.mulf %36, %25 : vector<128x128xf32>
    %39 = arith.addf %38, %33 : vector<128x128xf32>
    %40 = arith.select %37, %25, %39 : vector<128x128xi1>, vector<128x128xf32>
    %c0_30 = arith.constant 0 : index
    %c0_31 = arith.constant 0 : index
    %41 = vector.load %arg14[%c0_30, %c0_31] : memref<128x128xf32, #tpu.memory_space<vmem>>, vector<128x128xf32>
    %cst_32 = arith.constant dense<0.000000e+00> : vector<128x128xf32>
    %42 = tpu.matmul %40, %41, %cst_32 {dimension_numbers = #tpu.dot_dimension_numbers<[1], [0], [0], [1], [0, 0, 1, 1], [], []>} : vector<128x128xf32>, vector<128x128xf32>, vector<128x128xf32> -> vector<128x128xf32>
    %c0_33 = arith.constant 0 : index
    %c0_34 = arith.constant 0 : index
    %43 = vector.load %arg15[%c0_33, %c0_34] : memref<1x128xf32, #tpu.memory_space<vmem>>, vector<1x128xf32>
    %44 = vector.broadcast %43 : vector<1x128xf32> to vector<128x128xf32>
    %45 = arith.addf %42, %44 : vector<128x128xf32>
    %c0_35 = arith.constant 0 : index
    %c0_36 = arith.constant 0 : index
    %46 = vector.load %arg16[%c0_35, %c0_36] : memref<2x128xf32, #tpu.memory_space<vmem>>, vector<2x128xf32>
    %c0_37 = arith.constant 0 : index
    %c0_38 = arith.constant 0 : index
    %47 = vector.load %arg17[%c0_37, %c0_38] : memref<1x128xf32, #tpu.memory_space<vmem>>, vector<1x128xf32>
    %c0_39 = arith.constant 0 : index
    %c0_40 = arith.constant 0 : index
    %48 = vector.load %arg18[%c0_39, %c0_40] : memref<2x128xf32, #tpu.memory_space<vmem>>, vector<2x128xf32>
    %c0_41 = arith.constant 0 : index
    %c0_42 = arith.constant 0 : index
    %49 = vector.load %arg19[%c0_41, %c0_42] : memref<1x128xf32, #tpu.memory_space<vmem>>, vector<1x128xf32>
    %50 = vector.extract_strided_slice %45 {offsets = [0, 62], sizes = [128, 2], strides = [1, 1]} : vector<128x128xf32> to vector<128x2xf32>
    %cst_43 = arith.constant dense<0.000000e+00> : vector<128x128xf32>
    %51 = tpu.matmul %50, %46, %cst_43 {dimension_numbers = #tpu.dot_dimension_numbers<[1], [0], [0], [1], [0, 0, 1, 1], [], []>} : vector<128x2xf32>, vector<2x128xf32>, vector<128x128xf32> -> vector<128x128xf32>
    %52 = vector.broadcast %47 : vector<1x128xf32> to vector<128x128xf32>
    %53 = arith.addf %51, %52 : vector<128x128xf32>
    %cst_44 = arith.constant dense<0.000000e+00> : vector<128x128xf32>
    %54 = tpu.matmul %50, %48, %cst_44 {dimension_numbers = #tpu.dot_dimension_numbers<[1], [0], [0], [1], [0, 0, 1, 1], [], []>} : vector<128x2xf32>, vector<2x128xf32>, vector<128x128xf32> -> vector<128x128xf32>
    %55 = vector.broadcast %49 : vector<1x128xf32> to vector<128x128xf32>
    %56 = arith.addf %54, %55 : vector<128x128xf32>
    %57 = arith.cmpf ogt, %45, %53 : vector<128x128xf32>
    %58 = arith.mulf %56, %45 : vector<128x128xf32>
    %59 = arith.addf %58, %53 : vector<128x128xf32>
    %60 = arith.select %57, %45, %59 : vector<128x128xi1>, vector<128x128xf32>
    %c0_45 = arith.constant 0 : index
    %c0_46 = arith.constant 0 : index
    %61 = vector.load %arg20[%c0_45, %c0_46] : memref<128x128xf32, #tpu.memory_space<vmem>>, vector<128x128xf32>
    %cst_47 = arith.constant dense<0.000000e+00> : vector<128x128xf32>
    %62 = tpu.matmul %60, %61, %cst_47 {dimension_numbers = #tpu.dot_dimension_numbers<[1], [0], [0], [1], [0, 0, 1, 1], [], []>} : vector<128x128xf32>, vector<128x128xf32>, vector<128x128xf32> -> vector<128x128xf32>
    %c0_48 = arith.constant 0 : index
    %c0_49 = arith.constant 0 : index
    %63 = vector.load %arg21[%c0_48, %c0_49] : memref<1x128xf32, #tpu.memory_space<vmem>>, vector<1x128xf32>
    %64 = vector.broadcast %63 : vector<1x128xf32> to vector<128x128xf32>
    %65 = arith.addf %62, %64 : vector<128x128xf32>
    %66 = vector.extract_strided_slice %65 {offsets = [0, 29], sizes = [128, 1], strides = [1, 1]} : vector<128x128xf32> to vector<128x1xf32>
    %67 = arith.negf %66 : vector<128x1xf32>
    %68 = math.exp %67 : vector<128x1xf32>
    %cst_50 = arith.constant 1.000000e+00 : f32
    %69 = vector.broadcast %cst_50 : f32 to vector<128x1xf32>
    %70 = arith.addf %69, %68 : vector<128x1xf32>
    %71 = arith.divf %69, %70 : vector<128x1xf32>
    %72 = tpu.iota {dimensions = array<i32: 1>} : vector<128x128xi32>
    %c30_i32 = arith.constant 30 : i32
    %73 = vector.broadcast %c30_i32 : i32 to vector<128x128xi32>
    %74 = arith.cmpi eq, %72, %73 : vector<128x128xi32>
    %75 = vector.shape_cast %71 : vector<128x1xf32> to vector<128x1xf32>
    %76 = vector.broadcast %75 : vector<128x1xf32> to vector<128x128xf32>
    %77 = arith.select %74, %76, %65 : vector<128x128xi1>, vector<128x128xf32>
    %c0_51 = arith.constant 0 : index
    %c0_52 = arith.constant 0 : index
    %78 = vector.load %arg22[%c0_51, %c0_52] : memref<128x128xf32, #tpu.memory_space<vmem>>, vector<128x128xf32>
    tpu.vector_store %arg22[%c0_51, %c0_52], %77 {strides = array<i32>} : memref<128x128xf32, #tpu.memory_space<vmem>>, vector<128x128xf32>,
    return
  }
  func.func @transform_0(%arg0: i32) -> (i32, i32) {
    %c0_i32 = arith.constant 0 : i32
    %c0_i32_0 = arith.constant 0 : i32
    return %arg0, %c0_i32 : i32, i32
  }
  func.func @transform_1(%arg0: i32) -> (i32, i32) {
    %c0_i32 = arith.constant 0 : i32
    %c0_i32_0 = arith.constant 0 : i32
    %c0_i32_1 = arith.constant 0 : i32
    return %c0_i32, %c0_i32_0 : i32, i32
  }
  func.func @transform_2(%arg0: i32) -> (i32, i32) {
    %c0_i32 = arith.constant 0 : i32
    %c0_i32_0 = arith.constant 0 : i32
    %c0_i32_1 = arith.constant 0 : i32
    return %c0_i32, %c0_i32_0 : i32, i32
  }
  func.func @transform_3(%arg0: i32) -> (i32, i32) {
    %c0_i32 = arith.constant 0 : i32
    %c0_i32_0 = arith.constant 0 : i32
    %c0_i32_1 = arith.constant 0 : i32
    return %c0_i32, %c0_i32_0 : i32, i32
  }
  func.func @transform_4(%arg0: i32) -> (i32, i32) {
    %c0_i32 = arith.constant 0 : i32
    %c0_i32_0 = arith.constant 0 : i32
    %c0_i32_1 = arith.constant 0 : i32
    return %c0_i32, %c0_i32_0 : i32, i32
  }
  func.func @transform_5(%arg0: i32) -> (i32, i32) {
    %c0_i32 = arith.constant 0 : i32
    %c0_i32_0 = arith.constant 0 : i32
    %c0_i32_1 = arith.constant 0 : i32
    return %c0_i32, %c0_i32_0 : i32, i32
  }
  func.func @transform_6(%arg0: i32) -> (i32, i32) {
    %c0_i32 = arith.constant 0 : i32
    %c0_i32_0 = arith.constant 0 : i32
    %c0_i32_1 = arith.constant 0 : i32
    return %c0_i32, %c0_i32_0 : i32, i32
  }
  func.func @transform_7(%arg0: i32) -> (i32, i32) {
    %c0_i32 = arith.constant 0 : i32
    %c0_i32_0 = arith.constant 0 : i32
    %c0_i32_1 = arith.constant 0 : i32
    return %c0_i32, %c0_i32_0 : i32, i32
  }
  func.func @transform_8(%arg0: i32) -> (i32, i32) {
    %c0_i32 = arith.constant 0 : i32
    %c0_i32_0 = arith.constant 0 : i32
    %c0_i32_1 = arith.constant 0 : i32
    return %c0_i32, %c0_i32_0 : i32, i32
  }
  func.func @transform_9(%arg0: i32) -> (i32, i32) {
    %c0_i32 = arith.constant 0 : i32
    %c0_i32_0 = arith.constant 0 : i32
    %c0_i32_1 = arith.constant 0 : i32
    return %c0_i32, %c0_i32_0 : i32, i32
  }
  func.func @transform_10(%arg0: i32) -> (i32, i32) {
    %c0_i32 = arith.constant 0 : i32
    %c0_i32_0 = arith.constant 0 : i32
    %c0_i32_1 = arith.constant 0 : i32
    return %c0_i32, %c0_i32_0 : i32, i32
  }
  func.func @transform_11(%arg0: i32) -> (i32, i32) {
    %c0_i32 = arith.constant 0 : i32
    %c0_i32_0 = arith.constant 0 : i32
    %c0_i32_1 = arith.constant 0 : i32
    return %c0_i32, %c0_i32_0 : i32, i32
  }
  func.func @transform_12(%arg0: i32) -> (i32, i32) {
    %c0_i32 = arith.constant 0 : i32
    %c0_i32_0 = arith.constant 0 : i32
    %c0_i32_1 = arith.constant 0 : i32
    return %c0_i32, %c0_i32_0 : i32, i32
  }
  func.func @transform_13(%arg0: i32) -> (i32, i32) {
    %c0_i32 = arith.constant 0 : i32
    %c0_i32_0 = arith.constant 0 : i32
    %c0_i32_1 = arith.constant 0 : i32
    return %c0_i32, %c0_i32_0 : i32, i32
  }
  func.func @transform_14(%arg0: i32) -> (i32, i32) {
    %c0_i32 = arith.constant 0 : i32
    %c0_i32_0 = arith.constant 0 : i32
    %c0_i32_1 = arith.constant 0 : i32
    return %c0_i32, %c0_i32_0 : i32, i32
  }
  func.func @transform_15(%arg0: i32) -> (i32, i32) {
    %c0_i32 = arith.constant 0 : i32
    %c0_i32_0 = arith.constant 0 : i32
    %c0_i32_1 = arith.constant 0 : i32
    return %c0_i32, %c0_i32_0 : i32, i32
  }
  func.func @transform_16(%arg0: i32) -> (i32, i32) {
    %c0_i32 = arith.constant 0 : i32
    %c0_i32_0 = arith.constant 0 : i32
    %c0_i32_1 = arith.constant 0 : i32
    return %c0_i32, %c0_i32_0 : i32, i32
  }
  func.func @transform_17(%arg0: i32) -> (i32, i32) {
    %c0_i32 = arith.constant 0 : i32
    %c0_i32_0 = arith.constant 0 : i32
    %c0_i32_1 = arith.constant 0 : i32
    return %c0_i32, %c0_i32_0 : i32, i32
  }
  func.func @transform_18(%arg0: i32) -> (i32, i32) {
    %c0_i32 = arith.constant 0 : i32
    %c0_i32_0 = arith.constant 0 : i32
    %c0_i32_1 = arith.constant 0 : i32
    return %c0_i32, %c0_i32_0 : i32, i32
  }
  func.func @transform_19(%arg0: i32) -> (i32, i32) {
    %c0_i32 = arith.constant 0 : i32
    %c0_i32_0 = arith.constant 0 : i32
    %c0_i32_1 = arith.constant 0 : i32
    return %c0_i32, %c0_i32_0 : i32, i32
  }
  func.func @transform_20(%arg0: i32) -> (i32, i32) {
    %c0_i32 = arith.constant 0 : i32
    %c0_i32_0 = arith.constant 0 : i32
    %c0_i32_1 = arith.constant 0 : i32
    return %c0_i32, %c0_i32_0 : i32, i32
  }
  func.func @transform_21(%arg0: i32) -> (i32, i32) {
    %c0_i32 = arith.constant 0 : i32
    %c0_i32_0 = arith.constant 0 : i32
    return %arg0, %c0_i32 : i32, i32
  }
}

</mosaic_0001>

<bundles_post_ra>
// kernel: tpu_custom_call.1
= control target key start
LH: loop header
LB: loop body
LE: loop exit
PB: predicated region body
PF: predicated region fallthrough
CT: control target
= control target key end

     0   :  { %s5589_s0 = inlined_call_operand.hbm [shape: f32[256,128], index: 0, kind: input, shape index: {}]   ;;  %s5590_s1 = inlined_call_operand.hbm [shape: f32[128,128], index: 1, kind: input, shape index: {}]   ;;  %s5591_s2 = inlined_call_operand.vmem [shape: f32[1,128], index: 2, kind: input, shape index: {}]   ;;  %s5592_s3 = inlined_call_operand.vmem [shape: f32[2,128], index: 3, kind: input, shape index: {}]   ;;  %s5593_s4 = inlined_call_operand.vmem [shape: f32[1,128], index: 4, kind: input, shape index: {}]   ;;  %s5594_s5 = inlined_call_operand.vmem [shape: f32[2,128], index: 5, kind: input, shape index: {}]   ;;  %s5595_s6 = inlined_call_operand.vmem [shape: f32[1,128], index: 6, kind: input, shape index: {}]   ;;  %s5596_s7 = inlined_call_operand.hbm [shape: f32[128,128], index: 7, kind: input, shape index: {}]   ;;  %s5597_s8 = inlined_call_operand.vmem [shape: f32[1,128], index: 8, kind: input, shape index: {}]   ;;  %s5598_s9 = inlined_call_operand.vmem [shape: f32[2,128], index: 9, kind: input, shape index: {}]   ;;  %s5599_s10 = inlined_call_operand.vmem [shape: f32[1,128], index: 10, kind: input, shape index: {}]   ;;  %s5600_s11 = inlined_call_operand.vmem [shape: f32[2,128], index: 11, kind: input, shape index: {}]   ;;  %s5601_s12 = inlined_call_operand.vmem [shape: f32[1,128], index: 12, kind: input, shape index: {}]   ;;  %s5602_s13 = inlined_call_operand.hbm [shape: f32[128,128], index: 13, kind: input, shape index: {}]   ;;  %s5603_s14 = inlined_call_operand.vmem [shape: f32[1,128], index: 14, kind: input, shape index: {}]   ;;  %s5604_s15 = inlined_call_operand.vmem [shape: f32[2,128], index: 15, kind: input, shape index: {}]   ;;  %s5605_s16 = inlined_call_operand.vmem [shape: f32[1,128], index: 16, kind: input, shape index: {}]   ;;  %s5606_s17 = inlined_call_operand.vmem [shape: f32[2,128], index: 17, kind: input, shape index: {}]   ;;  %s5607_s18 = inlined_call_operand.vmem [shape: f32[1,128], index: 18, kind: input, shape index: {}]   ;;  %s5608_s19 = inlined_call_operand.hbm [shape: f32[128,128], index: 19, kind: input, shape index: {}]   ;;  %s5609_s20 = inlined_call_operand.vmem [shape: f32[1,128], index: 20, kind: input, shape index: {}]   ;;  %s5610_s21 = inlined_call_operand.hbm [shape: f32[256,128], index: 21, kind: output, shape index: {}]  }
   0x1   :  { %5620 = sst [smem:[#allocation18_spill]] %s5589_s0 }
   0x2   :  { %5621 = sst [smem:[#allocation19_spill]] %s5590_s1 }
   0x3   :  { %5622 = sst [smem:[#allocation20_spill]] %s5591_s2 }
   0x4   :  { %5623 = sst [smem:[#allocation21_spill]] %s5592_s3 }
   0x5   :  { %5624 = sst [smem:[#allocation22_spill]] %s5593_s4 }
   0x6   :  { %5625 = sst [smem:[#allocation23_spill]] %s5594_s5 }
   0x7   :  { %5626 = sst [smem:[#allocation24_spill]] %s5599_s10 }
   0x8   :  { %5627 = sst [smem:[#allocation25_spill]] %s5603_s14 }
   0x9   :  { %5628 = sst [smem:[#allocation26_spill]] %s5604_s15 }
   0xa   :  { %5629 = sst [smem:[#allocation27_spill]] %s5605_s16 }
   0xb   :  { %5630 = sst [smem:[#allocation28_spill]] %s5606_s17 }
   0xc   :  { %5631 = sst [smem:[#allocation29_spill]] %s5607_s18 }
   0xd   :  { %5632 = sst [smem:[#allocation30_spill]] %s5609_s20 }
   0xe   :  { %5633 = sst [smem:[#allocation31_spill]] %s5610_s21 }
   0xf   :  { %26 = vsyncpa [#allocation3], 0 }
  0x10   :  { %28 = vsyncpa [#allocation3 + $0x1], 0 }
  0x11   :  { %29 = vsyncpa [#allocation6], 0 }
  0x12   :  { %30 = vsyncpa [#allocation9], 0 }
  0x13   :  { %31 = vsyncpa [#allocation4], 0 }
  0x14   :  { %33 = vsyncpa [#allocation4 + $0x1], 0  ;;  %s4534_s2 = smov 0   ;;  %s4536_s25 = smov 0  }
  0x15   :  { %s4538_s26 = smov 0   ;;  %s4540_s27 = smov 0  }
  0x16 LB: > { %5634 = sst [smem:[#allocation16_spill]] %s4398_s2  ;;  %s4555_s3 = sadd.s32 4294967295, %s4410_s27   ;;  %s4410_s27 = sphi %s4540_s27, %s5673_s27   ;;  %s4406_s26 = sphi %s4538_s26, %s5672_s26   ;;  %s4402_s25 = sphi %s4536_s25, %s5671_s25   ;;  %s4398_s2 = sphi %s4534_s2, %s5670_s2  }
  0x17   : > { %s3129_s28 = sadd.s32 4294967294, %s4410_s27   ;;  %p59_p0 = scmp.ne.s32.totalorder %s4402_s25, %s4398_s2 }
  0x18   : > { %p5616_p1 = scmp.eq.s32.totalorder %s4555_s3, 0  ;;  %p509_p3 = scmp.eq.s32.totalorder %s3129_s28, 1 }
  0x19   : > { %p3130_p5 = scmp.ge.s32.totalorder %s4410_s27, 1  ;;  %p516_p7 = scmp.lt.s32.totalorder %s4410_s27, 3 }
  0x1a   : > { %p4564_p4 = por %p5616_p1, %p59_p0  ;;  %p4569_p6 = por %p509_p3, %p59_p0 }
  0x1b   : > { %p4574_p8 = pnand %p3130_p5, %p516_p7  ;;  %s4412_s30 = smov [#allocation5]  }
  0x1c   : > { %s5635_s29 = scalar_select %p4564_p4, 1, 0 }
  0x1d   : > { %s5636_s0 = scalar_select %p4569_p6, 1, 0 }
  0x1e   : > { %s5638_s4 = scalar_select %p4574_p8, 1, 0 }
  0x1f   : > { %5637 = sst [smem:[#allocation17_spill]] %s5636_s0  ;;  %s528_s5 = sshll.u32 %s4412_s30, 4  ;;  %s4578_s5 = int_to_ptr.vmem [resolvable:$true] %s528_s5 }
  0x20   : > { %p4055_p9 = pneg %p4574_p8  ;;  %s4413_s23 = smov [#allocation8]  }
  0x21   : > { %s584_s1 = sshll.u32 %s4413_s23, 4  ;;  %s4414_s24 = smov [#allocation7]   ;;  %s4589_s1 = int_to_ptr.vmem [resolvable:$true] %s584_s1 }
  0x22   : > { %p4585_p11 = pnand %p4055_p9, %p5616_p1  ;;  %s4591_s28 = sshll.u32 %s4414_s24, 4  ;;  %s557_s28 = int_to_ptr.vmem [resolvable:$true] %s4591_s28 }
  0x23   : > { %s5640_s2 = sld [smem:[#allocation19_spill]] }
  0x24   : > { %p4601_p13 = pneg %p4585_p11 }
  0x29   : > { %s5641_s21 = smov %s5640_s2  ;;  %s4194_s20 = scalar_lea.hbm %s5640_s2, 2048 }
  0x2a   : > { %p4195_p12 = scmp.ne.s32.totalorder %s5641_s21, %s4194_s20  ;;  %p4201_p5 = scmp.lt.u32.totalorder %s4194_s20, %s5641_s21 }
  0x2c   : > { %p4197_p0 = pnand %p4601_p13, %p4195_p12 }
  0x2e   : > { %p4198_p3 = pneg %p4197_p0 }
  0x30   : > { %p4203_p7 = pnand %p4201_p5, %p4198_p3 }
  0x32   : > { %4206 = shalt.err (!%p4203_p7)
}
  0x33   : > { %s4207_s16 = scalar_lea.vmem %s4578_s5, 2048  ;;  %p4215_p2 = scmp.lt.s32.totalorder %s4578_s5, %s4578_s5 }
  0x34   : > { %p4208_p9 = scmp.ne.s32.totalorder %s4578_s5, %s4207_s16  ;;  %p4216_p6 = scmp.lt.s32.totalorder %s4207_s16, %s4207_s16 }
  0x36   : > { %p4210_p10 = pnand %p4208_p9, %p4601_p13  ;;  %p4217_p12 = por %p4216_p6, %p4215_p2 }
  0x38   : > { %p4211_p1 = pneg %p4210_p10 }
  0x3a   : > { %p4218_p0 = pnand %p4217_p12, %p4211_p1 }
  0x3c   : > { %4221 = shalt.err (!%p4218_p0)
}
  0x3d   : > { %s5619_s18 = smov 128   ;;  %s4416_s20 = smov 8  }
  0x3e   : > { %4058 = dma.hbm_to_vmem [thread:$0]  (!%p4585_p11), %s5641_s21, 2048, %s4578_s5, [#allocation6], %s5619_s18, %s5619_s18, %s4416_s20  }
  0x3f   : > { %s4222_s24 = scalar_lea.hbm %s5602_s13, 2048 }
  0x40   : > { %p4223_p1 = scmp.ne.s32.totalorder %s5602_s13, %s4222_s24  ;;  %p4229_p10 = scmp.lt.u32.totalorder %s4222_s24, %s5602_s13 }
  0x42   : > { %p4225_p2 = pnand %p4223_p1, %p4601_p13 }
  0x44   : > { %p4226_p6 = pneg %p4225_p2 }
  0x46   : > { %p4231_p3 = pnand %p4229_p10, %p4226_p6 }
  0x48   : > { %4234 = shalt.err (!%p4231_p3)
}
  0x49   : > { %s4235_s5 = scalar_lea.vmem %s4589_s1, 2048  ;;  %p4243_p12 = scmp.lt.s32.totalorder %s4589_s1, %s4589_s1 }
  0x4a   : > { %p4236_p5 = scmp.ne.s32.totalorder %s4589_s1, %s4235_s5  ;;  %p4244_p0 = scmp.lt.s32.totalorder %s4235_s5, %s4235_s5 }
  0x4c   : > { %p4238_p7 = pnand %p4236_p5, %p4601_p13  ;;  %p4245_p1 = por %p4244_p0, %p4243_p12 }
  0x4e   : > { %p4239_p9 = pneg %p4238_p7 }
  0x50   : > { %p4246_p2 = pnand %p4245_p1, %p4239_p9 }
  0x52   : > { %4249 = shalt.err (!%p4246_p2)
}
  0x53   : > { %4064 = dma.hbm_to_vmem [thread:$0]  (!%p4585_p11), %s5602_s13, 2048, %s4589_s1, [#allocation9], %s5619_s18, %s5619_s18, %s4416_s20  }
  0x54   : > { %s4250_s0 = scalar_lea.hbm %s5596_s7, 2048 }
  0x55   : > { %p4251_p6 = scmp.ne.s32.totalorder %s5596_s7, %s4250_s0  ;;  %p4257_p5 = scmp.lt.u32.totalorder %s4250_s0, %s5596_s7 }
  0x57   : > { %p4253_p10 = pnand %p4251_p6, %p4601_p13 }
  0x59   : > { %p4254_p3 = pneg %p4253_p10 }
  0x5b   : > { %p4259_p7 = pnand %p4257_p5, %p4254_p3 }
  0x5d   : > { %4262 = shalt.err (!%p4259_p7)
}
  0x5e   : > { %s4263_s5 = scalar_lea.vmem %s557_s28, 2048  ;;  %p4271_p1 = scmp.lt.s32.totalorder %s557_s28, %s557_s28 }
  0x5f   : > { %p4264_p9 = scmp.ne.s32.totalorder %s557_s28, %s4263_s5  ;;  %p4272_p2 = scmp.lt.s32.totalorder %s4263_s5, %s4263_s5 }
  0x61   : > { %p4266_p12 = pnand %p4264_p9, %p4601_p13  ;;  %p4273_p4 = por %p4272_p2, %p4271_p1 }
  0x63   : > { %p4267_p0 = pneg %p4266_p12 }
  0x65   : > { %p4274_p8 = pnand %p4273_p4, %p4267_p0 }
  0x67   : > { %4277 = shalt.err (!%p4274_p8)
}
  0x68   : > { %4061 = dma.hbm_to_vmem [thread:$0]  (!%p4585_p11), %s5596_s7, 2048, %s557_s28, [#allocation6], %s5619_s18, %s5619_s18, %s4416_s20  }
  0x69   : > { %s4417_s15 = smov [#allocation10]   ;;  %s4278_s30 = scalar_lea.hbm %s5608_s19, 2048 }
  0x6a   : > { %s612_s17 = sshll.u32 %s4417_s15, 4  ;;  %p4279_p4 = scmp.ne.s32.totalorder %s5608_s19, %s4278_s30  ;;  %s613_s17 = int_to_ptr.vmem [resolvable:$true] %s612_s17 }
  0x6b   : > { %p4285_p10 = scmp.lt.u32.totalorder %s4278_s30, %s5608_s19 }
  0x6c   : > { %p4281_p8 = pnand %p4279_p4, %p4601_p13 }
  0x6e   : > { %p4282_p6 = pneg %p4281_p8 }
  0x70   : > { %p4287_p3 = pnand %p4285_p10, %p4282_p6 }
  0x72   : > { %4290 = shalt.err (!%p4287_p3)
}
  0x73   : > { %s4291_s28 = scalar_lea.vmem %s613_s17, 2048  ;;  %p4299_p12 = scmp.lt.s32.totalorder %s613_s17, %s613_s17 }
  0x74   : > { %p4292_p5 = scmp.ne.s32.totalorder %s613_s17, %s4291_s28  ;;  %p4300_p0 = scmp.lt.s32.totalorder %s4291_s28, %s4291_s28 }
  0x76   : > { %p4294_p7 = pnand %p4292_p5, %p4601_p13  ;;  %p4301_p1 = por %p4300_p0, %p4299_p12 }
  0x78   : > { %p4295_p9 = pneg %p4294_p7 }
  0x7a   : > { %p4302_p2 = pnand %p4301_p1, %p4295_p9 }
  0x7c   : > { %4305 = shalt.err (!%p4302_p2)
}
  0x7d   : > { %4067 = dma.hbm_to_vmem [thread:$0]  (!%p4585_p11), %s5608_s19, 2048, %s613_s17, [#allocation9], %s5619_s18, %s5619_s18, %s4416_s20  }
  0x7e   : > { %s4695_s14 = sadd.s32 1, %s4410_s27   ;;  %s46_s22 = sadd.s32 1, %s4406_s26 }
  0x7f   : > { %s43_s15 = ssub.s32 %s4410_s27, %s4695_s14  ;;  %p53_p13 = scmp.ne.s32.totalorder %s4406_s26, %s4402_s25 }
  0x80   : > { %p44_p4 = scmp.eq.s32.totalorder %s43_s15, 0  ;;  %p54_p8 = scmp.eq.s32.totalorder %s4410_s27, 0 }
  0x81   : > { %p5643_p6 = scmp.eq.s32.totalorder %s4555_s3, 1  ;;  %p4080_p3 = scmp.lt.s32.totalorder %s4410_s27, 2 }
  0x82   : > { %s4711_s0 = scalar_select %p44_p4, %s4406_s26, %s46_s22  }
  0x83   : > { %p4705_p10 = por %p5643_p6, %p53_p13  ;;  %p55_p5 = por %p54_p8, %p53_p13 }
  0x84   : > { %s629_s30 = sand.u32 1, %s4406_s26   ;;  %s3279_s17 = sshll.u32 %s4410_s27, 11 }
  0x85   : > { %s3136_s23 = sshll.u32 %s629_s30, 7  ;;  %s5645_s5 = sld [smem:[#allocation18_spill]] }
  0x86   : > { %s633_s1 = scalar_lea.vmem [#allocation2], %s3136_s23  ;;  %p4722_p11 = pnand %p4080_p3, %p55_p5 }
  0x87   : > { %s640_s10 = sshll.u32 %s633_s1, 4  ;;  %s4726_s15 = scalar_lea.sflag [#allocation3], %s629_s30  ;;  %s4720_s10 = int_to_ptr.vmem [resolvable:$true] %s640_s10 }
  0x88   : > { %p4308_p9 = pneg %p4722_p11 }
  0x8b   : > { %s4718_s28 = scalar_lea.hbm %s5645_s5, %s3279_s17  ;;  %s4311_s24 = scalar_lea.hbm %s5645_s5, 4096 }
  0x8c   : > { %s4306_s18 = scalar_lea.hbm %s4718_s28, 2048  ;;  %p4312_p1 = scmp.lt.u32.totalorder %s4718_s28, %s5645_s5 }
  0x8d   : > { %p4307_p7 = scmp.ne.s32.totalorder %s4718_s28, %s4306_s18  ;;  %p4313_p2 = scmp.lt.u32.totalorder %s4311_s24, %s4306_s18 }
  0x8e   : > { %p4315_p4 = scmp.lt.u32.totalorder %s4306_s18, %s4718_s28 }
  0x8f   : > { %p4309_p12 = pnand %p4308_p9, %p4307_p7  ;;  %p4314_p13 = por %p4313_p2, %p4312_p1 }
  0x91   : > { %p4310_p0 = pneg %p4309_p12  ;;  %p4316_p8 = por %p4315_p4, %p4314_p13 }
  0x93   : > { %p4317_p6 = pnand %p4316_p8, %p4310_p0 }
  0x95   : > { %4320 = shalt.err (!%p4317_p6)
}
  0x96   : > { %s4321_s30 = scalar_lea.vmem %s4720_s10, 2048  ;;  %s4418_s23 = smov [#allocation2]  }
  0x97   : > { %p4322_p3 = scmp.ne.s32.totalorder %s4720_s10, %s4321_s30  ;;  %s4326_s17 = sshll.u32 %s4418_s23, 4  ;;  %s4327_s17 = int_to_ptr.vmem [resolvable:$false] %s4326_s17 }
  0x98   : > { %s4328_s16 = scalar_lea.vmem %s4327_s17, 4096  ;;  %p4329_p12 = scmp.lt.s32.totalorder %s4720_s10, %s4327_s17 }
  0x99   : > { %p4324_p5 = pnand %p4322_p3, %p4308_p9  ;;  %p4330_p1 = scmp.lt.s32.totalorder %s4328_s16, %s4321_s30 }
  0x9b   : > { %p4325_p7 = pneg %p4324_p5  ;;  %p4331_p2 = por %p4330_p1, %p4329_p12 }
  0x9d   : > { %p4332_p13 = pnand %p4331_p2, %p4325_p7 }
  0x9f   : > { %4335 = shalt.err (!%p4332_p13)
}
  0xa0   : > { %s5647_s18 = smov 128   ;;  %p5648_p9 = scmp.ne.s32.totalorder %s5638_s4, 0 }
  0xa1   : > { %4071 = dma.hbm_to_vmem [thread:$0]  (!%p4722_p11), %s4718_s28, 2048, %s4720_s10, %s4726_s15, %s5647_s18, %s5647_s18, %s4416_s20  }
  0xa2   : > { %652 = sbr.rel (%p5648_p9) target bundleno = 2318 (0x90e), region = 104  ;;  %s4760_s24 = sand.u32 (!%p5648_p9), 1, %s4402_s25  }
  0xa3   : > { %s3140_s1 = sshll.u32 (!%p5648_p9), %s4760_s24, 7  ;;  %s655_s30 = scalar_lea.sflag (!%p5648_p9), [#allocation3], %s4760_s24 }
  0xa4   : > { %s4766_s22 = scalar_lea.vmem (!%p5648_p9), [#allocation2], %s3140_s1  ;;  %p5649_p0 = scmp.ne.s32.totalorder (!%p5648_p9), %s5635_s29, 0 }
  0xa9   : > { %4381 = dma.done.wait (%p5649_p0), %s655_s30, 2048  }
  0xaa   : > { %4383 = vsyncadd (%p5649_p0), %s655_s30, 4294965248  ;;  %p5650_p11 = scmp.eq.s32.totalorder %s4555_s3, 0 }
  0xac   : > { %4385 = dma.done.wait (%p5650_p11), [#allocation6], 4096   ;;  %p5651_p4 = pmov %p5650_p11 }
  0xae   : > { %4387 = vsyncadd (%p5651_p4), [#allocation6], 4294963200  ;;  %p5652_p8 = pmov %p5651_p4 }
  0xaf   : > { %p5653_p6 = pmov %p5651_p4 }
  0xb0   : > { %4389 = dma.done.wait (%p5652_p8), [#allocation9], 4096  }
  0xb1   : > { %4391 = vsyncadd (%p5653_p6), [#allocation9], 4294963200  ;;  %v751_v0 = vld [vmem:[#allocation5] sm:$0xff]  ;;  %v752_v1 = vld [vmem:[#allocation5 + $0x8] sm:$0xff]  ;;  %s5654_s20 = sld [smem:[#allocation21_spill]]  ;;  %vm1010_vm0 = vcmask 1041408  }
  0xb2   : > { %v753_v2 = vld [vmem:[#allocation5 + $0x10] sm:$0xff]  ;;  %v3891_v3 = vpack.c.bf16 %v752_v1, %v751_v0  ;;  %v754_v4 = vld [vmem:[#allocation5 + $0x18] sm:$0xff]  ;;  %v755_v6 = vld [vmem:[#allocation5 + $0x20] sm:$0xff]  ;;  %s5655_s15 = sld [smem:[#allocation23_spill]]  ;;  %s5656_s16 = sld [smem:[#allocation20_spill]]  ;;  %vm977_vm1 = vcmask 15360  }
  0xb3   : > { %v3895_v5 = vpack.c.bf16 %v754_v4, %v753_v2  ;;  %v756_v7 = vld [vmem:[#allocation5 + $0x28] sm:$0xff]  ;;  %v735_v9 = vld [vmem:[%s4766_s22] sm:$0xff]  ;;  %v757_v10 = vld [vmem:[#allocation5 + $0x30] sm:$0xff]  ;;  %s4419_s18 = smov 66   ;;  %s5661_s29 = sld [smem:[#allocation25_spill]] }
  0xb4   : > { %3892 = vmatprep.subr.bf16.mxu0 %v3891_v3  ;;  %v3899_v8 = vpack.c.bf16 %v756_v7, %v755_v6  ;;  %v758_v11 = vld [vmem:[#allocation5 + $0x38] sm:$0xff]  ;;  %3543 = vmatprep.mubr.f32.mxu0 %v735_v9  ;;  %v759_v13 = vld [vmem:[#allocation5 + $0x40] sm:$0xff]  ;;  %v760_v14 = vld [vmem:[#allocation5 + $0x48] sm:$0xff]  ;;  %s5490_s30 = scalar_lea.vmem [#allocation11], %s3140_s1  ;;  %s3280_s1 = sshll.u32 %s4555_s3, 11 }
  0xb5   : > { %3894 = vmatpush3.bf16.msra.mxu0 %v3891_v3  ;;  %v3903_v12 = vpack.c.bf16 %v758_v11, %v757_v10  ;;  %v3907_v15 = vpack.c.bf16 %v760_v14, %v759_v13  ;;  %v761_v16 = vld [vmem:[#allocation5 + $0x50] sm:$0xff]  ;;  %v762_v17 = vld [vmem:[#allocation5 + $0x58] sm:$0xff]  ;;  %v763_v19 = vld [vmem:[#allocation5 + $0x60] sm:$0xff]  ;;  %s5665_s4 = sld [smem:[#allocation31_spill]]  ;;  %s3005_s3 = scalar_lea.sflag [#allocation4], %s4760_s24 }
  0xb6   : > { %3896 = vmatprep.subr.bf16.mxu0 %v3895_v5  ;;  %v3911_v18 = vpack.c.bf16 %v762_v17, %v761_v16  ;;  %v764_v20 = vld [vmem:[#allocation5 + $0x68] sm:$0xff]  ;;  %v765_v22 = vld [vmem:[#allocation5 + $0x70] sm:$0xff]  ;;  %v766_v23 = vld [vmem:[#allocation5 + $0x78] sm:$0xff]  ;;  %s4421_s10 = smov [#allocation11]  }
  0xb7   : > { %v3915_v21 = vpack.c.bf16 %v764_v20, %v763_v19  ;;  %v3919_v24 = vpack.c.bf16 %v766_v23, %v765_v22  ;;  %v736_v25 = vld [vmem:[%s4766_s22 + $0x8] sm:$0xff]  ;;  %v737_v26 = vld [vmem:[%s4766_s22 + $0x10] sm:$0xff]  ;;  %v738_v27 = vld [vmem:[%s4766_s22 + $0x18] sm:$0xff] }
  0xb8   : > { %v739_v28 = vld [vmem:[%s4766_s22 + $0x20] sm:$0xff]  ;;  %v740_v29 = vld [vmem:[%s4766_s22 + $0x28] sm:$0xff]  ;;  %v741_v30 = vld [vmem:[%s4766_s22 + $0x30] sm:$0xff] }
  0xb9   : > { %3898 = vmatpush3.bf16.msra.mxu0 %v3895_v5  ;;  %v742_v31 = vld [vmem:[%s4766_s22 + $0x38] sm:$0xff]  ;;  %v743_v32 = vld [vmem:[%s4766_s22 + $0x40] sm:$0xff]  ;;  %v744_v33 = vld [vmem:[%s4766_s22 + $0x48] sm:$0xff] }
  0xba   : > { %3900 = vmatprep.subr.bf16.mxu0 %v3899_v8  ;;  %v745_v34 = vld [vmem:[%s4766_s22 + $0x50] sm:$0xff]  ;;  %v746_v35 = vld [vmem:[%s4766_s22 + $0x58] sm:$0xff]  ;;  %v747_v36 = vld [vmem:[%s4766_s22 + $0x60] sm:$0xff] }
  0xbb   : > { %v748_v37 = vld [vmem:[%s4766_s22 + $0x68] sm:$0xff]  ;;  %v749_v38 = vld [vmem:[%s4766_s22 + $0x70] sm:$0xff]  ;;  %v750_v39 = vld [vmem:[%s4766_s22 + $0x78] sm:$0xff]  ;;  %s3018_s22 = sshll.u32 %s5490_s30, 4  ;;  %s5539_s22 = int_to_ptr.vmem [resolvable:$true] %s3018_s22 }
  0xbc   : > { %v919_v40 = vld [vmem:[%s5654_s20] sm:$0x3]  ;;  %s5657_s20 = sld [smem:[#allocation22_spill]]  ;;  %s4336_s28 = scalar_lea.vmem %s5539_s22, 2048 }
  0xbd   : > { %3902 = vmatpush3.bf16.msra.mxu0 %v3899_v8  ;;  %v921_v41 = vld [vmem:[%s5655_s15] sm:$0x3]  ;;  %3567 = vmatprep.subr.msk.mxu1 %vm1010_vm0, %v919_v40  ;;  %s5659_s15 = sld [smem:[#allocation28_spill]]  ;;  %p4337_p3 = scmp.ne.s32.totalorder %s5539_s22, %s4336_s28 }
  0xbe   : > { %3904 = vmatprep.subr.bf16.mxu0 %v3903_v12  ;;  %3568 = vmatpush3.msk.msra.mxu1 %vm1010_vm0, %v919_v40  ;;  %v3146_v42 = vld [vmem:[%s5656_s16] ss:$0 sm:$0xff]  ;;  %v1386_v40 = vld [vmem:[#allocation7 + $0x48] sm:$0xff]  ;;  %s5660_s16 = sld [smem:[#allocation26_spill]] }
  0xbf   : > { %3593 = vmatprep.subr.msk.mxu1 %vm1010_vm0, %v921_v41  ;;  %p4338_p5 = pnand %p4337_p3, %p4705_p10 }
  0xc1   : > { %3906 = vmatpush3.bf16.msra.mxu0 %v3903_v12  ;;  %p4339_p7 = pneg %p4338_p5 }
  0xc2   : > { %3908 = vmatprep.subr.bf16.mxu0 %v3907_v15 }
  0xc5   : > { %3910 = vmatpush3.bf16.msra.mxu0 %v3907_v15 }
  0xc6   : > { %3912 = vmatprep.subr.bf16.mxu0 %v3911_v18 }
  0xc9   : > { %3914 = vmatpush3.bf16.msra.mxu0 %v3911_v18 }
  0xca   : > { %3916 = vmatprep.subr.bf16.mxu0 %v3915_v21 }
  0xcd   : > { %3918 = vmatpush3.bf16.msra.mxu0 %v3915_v21 }
  0xce   : > { %3920 = vmatprep.subr.bf16.mxu0 %v3919_v24 }
  0xd1   : > { %3922 = vmatpush3.bf16.msra.mxu0 %v3919_v24 }
  0xd4   : > { %3544 = vmatmul.mubr.f32.vlgmr.msra.gmra.mrb[0].mxu0 %v736_v25 }
  0xd5   : > { %3546 = vmatprep.mubr.f32.mxu0 %v737_v26 }
  0xd8   : > { %3547 = vmatmul.mubr.f32.gmra.mrb[2].mxu0 %v738_v27  ;;  %v1377_v27 = vld [vmem:[#allocation7] sm:$0xff] }
  0xd9   : > { %3549 = vmatprep.mubr.f32.mxu0 %v739_v28  ;;  %v1378_v28 = vld [vmem:[#allocation7 + $0x8] sm:$0xff] }
  0xdc   : > { %3550 = vmatmul.mubr.f32.gmra.mrb[4].mxu0 %v740_v29  ;;  %v3923_v29 = vpack.c.bf16 %v1378_v28, %v1377_v27 }
  0xdd   : > { %3552 = vmatprep.mubr.f32.mxu0 %v741_v30  ;;  %v1379_v30 = vld [vmem:[#allocation7 + $0x10] sm:$0xff] }
  0xde   : > { %3924 = vmatprep.subr.bf16.mxu0 %v3923_v29 }
  0xdf   : > { %3926 = vmatpush3.bf16.msra.mxu0 %v3923_v29 }
  0xe0   : > { %3553 = vmatmul.mubr.f32.gmra.mrb[6].mxu0 %v742_v31  ;;  %v1380_v31 = vld [vmem:[#allocation7 + $0x18] sm:$0xff] }
  0xe1   : > { %3555 = vmatprep.mubr.f32.mxu0 %v743_v32  ;;  %v3927_v32 = vpack.c.bf16 %v1380_v31, %v1379_v30 }
  0xe3   : > { %3928 = vmatprep.subr.bf16.mxu0 %v3927_v32 }
  0xe4   : > { %3556 = vmatmul.mubr.f32.gmra.mrb[8].mxu0 %v744_v33  ;;  %v1381_v33 = vld [vmem:[#allocation7 + $0x20] sm:$0xff] }
  0xe5   : > { %3558 = vmatprep.mubr.f32.mxu0 %v745_v34  ;;  %3930 = vmatpush3.bf16.msra.mxu0 %v3927_v32  ;;  %v1382_v34 = vld [vmem:[#allocation7 + $0x28] sm:$0xff] }
  0xe8   : > { %3559 = vmatmul.mubr.f32.gmra.mrb[10].mxu0 %v746_v35  ;;  %v3931_v35 = vpack.c.bf16 %v1382_v34, %v1381_v33 }
  0xe9   : > { %3561 = vmatprep.mubr.f32.mxu0 %v747_v36  ;;  %v1383_v36 = vld [vmem:[#allocation7 + $0x30] sm:$0xff] }
  0xea   : > { %3932 = vmatprep.subr.bf16.mxu0 %v3931_v35 }
  0xeb   : > { %3934 = vmatpush3.bf16.msra.mxu0 %v3931_v35 }
  0xec   : > { %3562 = vmatmul.mubr.f32.gmra.mrb[12].mxu0 %v748_v37  ;;  %v1384_v37 = vld [vmem:[#allocation7 + $0x38] sm:$0xff] }
  0xed   : > { %3564 = vmatprep.mubr.f32.mxu0 %v749_v38  ;;  %v3935_v38 = vpack.c.bf16 %v1384_v37, %v1383_v36 }
  0xef   : > { %3936 = vmatprep.subr.bf16.mxu0 %v3935_v38 }
  0xf0   : > { %3565 = vmatmul.mubr.f32.gmra.mrb[14].mxu0 %v750_v39  ;;  %v1385_v39 = vld [vmem:[#allocation7 + $0x40] sm:$0xff] }
  0xf1   : > { %3938 = vmatpush3.bf16.msra.mxu0 %v3935_v38 }
 0x1a7   : > { %v3545_v43 = vpop.f32.mrb[0].mxu0 }
 0x1a8   : > { %v840_v44 = vpop.f32.mrb[1].mxu0  ;;  %v4812_v48 = vadd.f32 %v3545_v43, %v3146_v42  ;;  %v1388_v43 = vld [vmem:[#allocation7 + $0x58] sm:$0xff] }
 0x1a9   : > { %v4808_v45 = vadd.f32 %v3146_v42, %v840_v44 }
 0x1ab   : > { %v3548_v46 = vpop.f32.mrb[2].mxu0  ;;  %945 = vrot.lane.b32.xlu0 %v4808_v45, %s4419_s18 }
 0x1ac   : > { %v850_v47 = vpop.f32.mrb[3].mxu0  ;;  %v4820_v52 = vadd.f32 %v3548_v46, %v3146_v42  ;;  %v1389_v46 = vld [vmem:[#allocation7 + $0x60] sm:$0xff] }
 0x1ad   : > { %v4814_v49 = vadd.f32 %v3146_v42, %v850_v47  ;;  %v1390_v47 = vld [vmem:[#allocation7 + $0x68] sm:$0xff] }
 0x1af   : > { %949 = vrot.lane.b32.xlu1 %v4814_v49, %s4419_s18  ;;  %947 = vrot.lane.b32.xlu0 %v4812_v48, %s4419_s18  ;;  %v3551_v50 = vpop.f32.mrb[4].mxu0 }
 0x1b0   : > { %v860_v51 = vpop.f32.mrb[5].mxu0  ;;  %v4828_v56 = vadd.f32 %v3551_v50, %v3146_v42  ;;  %v3947_v50 = vpack.c.bf16 %v1390_v47, %v1389_v46 }
 0x1b1   : > { %v4822_v53 = vadd.f32 %v3146_v42, %v860_v51  ;;  %v1391_v51 = vld [vmem:[#allocation7 + $0x70] sm:$0xff] }
 0x1b3   : > { %951 = vrot.lane.b32.xlu1 %v4820_v52, %s4419_s18  ;;  %v3554_v54 = vpop.f32.mrb[6].mxu0  ;;  %953 = vrot.lane.b32.xlu0 %v4822_v53, %s4419_s18 }
 0x1b4   : > { %v870_v55 = vpop.f32.mrb[7].mxu0  ;;  %v4836_v60 = vadd.f32 %v3554_v54, %v3146_v42  ;;  %v1392_v54 = vld [vmem:[#allocation7 + $0x78] sm:$0xff] }
 0x1b5   : > { %v4830_v57 = vadd.f32 %v3146_v42, %v870_v55  ;;  %v3951_v55 = vpack.c.bf16 %v1392_v54, %v1391_v51 }
 0x1b7   : > { %955 = vrot.lane.b32.xlu1 %v4828_v56, %s4419_s18  ;;  %v3557_v58 = vpop.f32.mrb[8].mxu0  ;;  %957 = vrot.lane.b32.xlu0 %v4830_v57, %s4419_s18 }
 0x1b8   : > { %v880_v59 = vpop.f32.mrb[9].mxu0  ;;  %v4844_v0 = vadd.f32 %v3557_v58, %v3146_v42 }
 0x1b9   : > { %v4838_v61 = vadd.f32 %v3146_v42, %v880_v59 }
 0x1bb   : > { %959 = vrot.lane.b32.xlu1 %v4836_v60, %s4419_s18  ;;  %v3560_v62 = vpop.f32.mrb[10].mxu0  ;;  %961 = vrot.lane.b32.xlu0 %v4838_v61, %s4419_s18 }
 0x1bc   : > { %v890_v63 = vpop.f32.mrb[11].mxu0  ;;  %v4852_v4 = vadd.f32 %v3560_v62, %v3146_v42 }
 0x1bd   : > { %v4846_v1 = vadd.f32 %v3146_v42, %v890_v63 }
 0x1bf   : > { %963 = vrot.lane.b32.xlu1 %v4844_v0, %s4419_s18  ;;  %v3563_v2 = vpop.f32.mrb[12].mxu0  ;;  %965 = vrot.lane.b32.xlu0 %v4846_v1, %s4419_s18 }
 0x1c0   : > { %v900_v3 = vpop.f32.mrb[13].mxu0  ;;  %v4860_v8 = vadd.f32 %v3563_v2, %v3146_v42 }
 0x1c1   : > { %v4854_v5 = vadd.f32 %v3146_v42, %v900_v3 }
 0x1c3   : > { %967 = vrot.lane.b32.xlu1 %v4852_v4, %s4419_s18  ;;  %v3566_v6 = vpop.f32.mrb[14].mxu0  ;;  %969 = vrot.lane.b32.xlu0 %v4854_v5, %s4419_s18 }
 0x1c4   : > { %v910_v7 = vpop.f32.mrb[15].mxu0  ;;  %v4868_v10 = vadd.f32 %v3566_v6, %v3146_v42 }
 0x1c5   : > { %v4862_v9 = vadd.f32 %v3146_v42, %v910_v7  ;;  %v1387_v42 = vld [vmem:[#allocation7 + $0x50] sm:$0xff] }
 0x1c6   : > { %v3943_v44 = vpack.c.bf16 %v1388_v43, %v1387_v42 }
 0x1c7   : > { %971 = vrot.lane.b32.xlu1 %v4860_v8, %s4419_s18  ;;  %973 = vrot.lane.b32.xlu0 %v4862_v9, %s4419_s18 }
 0x1cb   : > { %975 = vrot.lane.b32.xlu1 %v4868_v10, %s4419_s18 }
 0x21d   : > { %v946_v11 = vpop.permute.xlu0 %945 }
 0x21e   : > { %3569 = vmatprep.mubr.msk.f32.mxu1 %vm977_vm1, %v946_v11 }
 0x221   : > { %v950_v12 = vpop.permute.xlu1 %949  ;;  %v948_v13 = vpop.permute.xlu0 %947 }
 0x222   : > { %3570 = vmatmul.mubr.msk.f32.vlgmr.msra.gmra.mrb[0].mxu1 %vm977_vm1, %v948_v13 }
 0x223   : > { %3594 = vmatpush3.msk.msra.mxu1 %vm1010_vm0, %v921_v41  ;;  %3572 = vmatprep.mubr.msk.f32.mxu1 %vm977_vm1, %v950_v12  ;;  %v3939_v41 = vpack.c.bf16 %v1386_v40, %v1385_v39 }
 0x224   : > { %4019 = vmatprep.subr.bf16.mxu1 %v3923_v29 }
 0x225   : > { %v952_v14 = vpop.permute.xlu1 %951  ;;  %v954_v15 = vpop.permute.xlu0 %953  ;;  %3940 = vmatprep.subr.bf16.mxu0 %v3939_v41 }
 0x226   : > { %3573 = vmatmul.mubr.msk.f32.gmra.mrb[2].mxu1 %vm977_vm1, %v952_v14  ;;  %3942 = vmatpush3.bf16.msra.mxu0 %v3939_v41 }
 0x227   : > { %3575 = vmatprep.mubr.msk.f32.mxu1 %vm977_vm1, %v954_v15  ;;  %3944 = vmatprep.subr.bf16.mxu0 %v3943_v44 }
 0x229   : > { %v956_v16 = vpop.permute.xlu1 %955  ;;  %v958_v17 = vpop.permute.xlu0 %957 }
 0x22a   : > { %3576 = vmatmul.mubr.msk.f32.gmra.mrb[4].mxu1 %vm977_vm1, %v956_v16  ;;  %3946 = vmatpush3.bf16.msra.mxu0 %v3943_v44 }
 0x22b   : > { %3578 = vmatprep.mubr.msk.f32.mxu1 %vm977_vm1, %v958_v17  ;;  %3948 = vmatprep.subr.bf16.mxu0 %v3947_v50 }
 0x22d   : > { %v960_v18 = vpop.permute.xlu1 %959  ;;  %v962_v19 = vpop.permute.xlu0 %961 }
 0x22e   : > { %3579 = vmatmul.mubr.msk.f32.gmra.mrb[6].mxu1 %vm977_vm1, %v960_v18  ;;  %3950 = vmatpush3.bf16.msra.mxu0 %v3947_v50 }
 0x22f   : > { %3581 = vmatprep.mubr.msk.f32.mxu1 %vm977_vm1, %v962_v19  ;;  %3952 = vmatprep.subr.bf16.mxu0 %v3951_v55 }
 0x231   : > { %v964_v20 = vpop.permute.xlu1 %963  ;;  %v966_v21 = vpop.permute.xlu0 %965 }
 0x232   : > { %3582 = vmatmul.mubr.msk.f32.gmra.mrb[8].mxu1 %vm977_vm1, %v964_v20  ;;  %3954 = vmatpush3.bf16.msra.mxu0 %v3951_v55 }
 0x233   : > { %3584 = vmatprep.mubr.msk.f32.mxu1 %vm977_vm1, %v966_v21 }
 0x235   : > { %v968_v22 = vpop.permute.xlu1 %967  ;;  %v970_v23 = vpop.permute.xlu0 %969 }
 0x236   : > { %3585 = vmatmul.mubr.msk.f32.gmra.mrb[10].mxu1 %vm977_vm1, %v968_v22 }
 0x237   : > { %3587 = vmatprep.mubr.msk.f32.mxu1 %vm977_vm1, %v970_v23 }
 0x239   : > { %v972_v24 = vpop.permute.xlu1 %971  ;;  %v974_v25 = vpop.permute.xlu0 %973 }
 0x23a   : > { %3588 = vmatmul.mubr.msk.f32.gmra.mrb[12].mxu1 %vm977_vm1, %v972_v24 }
 0x23b   : > { %3590 = vmatprep.mubr.msk.f32.mxu1 %vm977_vm1, %v974_v25 }
 0x23d   : > { %v976_v26 = vpop.permute.xlu1 %975 }
 0x23e   : > { %3591 = vmatmul.mubr.msk.f32.gmra.mrb[14].mxu1 %vm977_vm1, %v976_v26 }
 0x23f   : > { %3595 = vmatprep.mubr.msk.f32.mxu1 %vm977_vm1, %v946_v11 }
 0x242   : > { %3596 = vmatmul.mubr.msk.f32.vlgmr.msra.gmra.mrb[16].mxu1 %vm977_vm1, %v948_v13 }
 0x243   : > { %3598 = vmatprep.mubr.msk.f32.mxu1 %vm977_vm1, %v950_v12  ;;  %4027 = vmatpush3.bf16.msra.mxu1 %v3923_v29 }
 0x244   : > { %4020 = vmatprep.subr.bf16.mxu1 %v3927_v32 }
 0x246   : > { %3599 = vmatmul.mubr.msk.f32.gmra.mrb[18].mxu1 %vm977_vm1, %v952_v14 }
 0x247   : > { %3601 = vmatprep.mubr.msk.f32.mxu1 %vm977_vm1, %v954_v15  ;;  %4028 = vmatpush3.bf16.msra.mxu1 %v3927_v32 }
 0x248   : > { %4021 = vmatprep.subr.bf16.mxu1 %v3931_v35 }
 0x24a   : > { %3602 = vmatmul.mubr.msk.f32.gmra.mrb[20].mxu1 %vm977_vm1, %v956_v16 }
 0x24b   : > { %3604 = vmatprep.mubr.msk.f32.mxu1 %vm977_vm1, %v958_v17  ;;  %4029 = vmatpush3.bf16.msra.mxu1 %v3931_v35 }
 0x24c   : > { %4022 = vmatprep.subr.bf16.mxu1 %v3935_v38 }
 0x24e   : > { %3605 = vmatmul.mubr.msk.f32.gmra.mrb[22].mxu1 %vm977_vm1, %v960_v18 }
 0x24f   : > { %3607 = vmatprep.mubr.msk.f32.mxu1 %vm977_vm1, %v962_v19  ;;  %4030 = vmatpush3.bf16.msra.mxu1 %v3935_v38  ;;  %v4924_v19 = vld [vmem:[%s5595_s6] ss:$0 sm:$0xff] }
 0x250   : > { %4023 = vmatprep.subr.bf16.mxu1 %v3939_v41 }
 0x252   : > { %3608 = vmatmul.mubr.msk.f32.gmra.mrb[24].mxu1 %vm977_vm1, %v964_v20  ;;  %v4929_v20 = vld [vmem:[%s5657_s20] ss:$0 sm:$0xff]  ;;  %s5658_s20 = sld [smem:[#allocation24_spill]] }
 0x253   : > { %3610 = vmatprep.mubr.msk.f32.mxu1 %vm977_vm1, %v966_v21  ;;  %4031 = vmatpush3.bf16.msra.mxu1 %v3939_v41 }
 0x254   : > { %4024 = vmatprep.subr.bf16.mxu1 %v3943_v44 }
 0x256   : > { %3611 = vmatmul.mubr.msk.f32.gmra.mrb[26].mxu1 %vm977_vm1, %v968_v22 }
 0x257   : > { %3613 = vmatprep.mubr.msk.f32.mxu1 %vm977_vm1, %v970_v23  ;;  %4032 = vmatpush3.bf16.msra.mxu1 %v3943_v44 }
 0x258   : > { %4025 = vmatprep.subr.bf16.mxu1 %v3947_v50 }
 0x25a   : > { %3614 = vmatmul.mubr.msk.f32.gmra.mrb[28].mxu1 %vm977_vm1, %v972_v24 }
 0x25b   : > { %3616 = vmatprep.mubr.msk.f32.mxu1 %vm977_vm1, %v974_v25  ;;  %4033 = vmatpush3.bf16.msra.mxu1 %v3947_v50 }
 0x25c   : > { %4026 = vmatprep.subr.bf16.mxu1 %v3951_v55 }
 0x25e   : > { %3617 = vmatmul.mubr.msk.f32.gmra.mrb[30].mxu1 %vm977_vm1, %v976_v26 }
 0x25f   : > { %4034 = vmatpush3.bf16.msra.mxu1 %v3951_v55 }
 0x2f5   : > { %v3571_v58 = vpop.f32.mrb[0].mxu1 }
 0x2f6   : > { %v1080_v59 = vpop.f32.mrb[1].mxu1  ;;  %v1086_v24 = vadd.f32 %v3571_v58, %v4929_v20 }
 0x2f7   : > { %v1081_v26 = vadd.f32 %v4929_v20, %v1080_v59 }
 0x2f8   : > { %vm1314_vm2 = vcmp.gt.f32.partialorder %v4812_v48, %v1086_v24 }
 0x2f9   : > { %v3574_v62 = vpop.f32.mrb[2].mxu1  ;;  %vm1313_vm3 = vcmp.gt.f32.partialorder %v4808_v45, %v1081_v26 }
 0x2fa   : > { %v1090_v63 = vpop.f32.mrb[3].mxu1  ;;  %v1096_v33 = vadd.f32 %v3574_v62, %v4929_v20 }
 0x2fb   : > { %v1091_v36 = vadd.f32 %v4929_v20, %v1090_v63 }
 0x2fc   : > { %vm1316_vm4 = vcmp.gt.f32.partialorder %v4820_v52, %v1096_v33 }
 0x2fd   : > { %v3577_v2 = vpop.f32.mrb[4].mxu1  ;;  %vm1315_vm5 = vcmp.gt.f32.partialorder %v4814_v49, %v1091_v36 }
 0x2fe   : > { %v1100_v3 = vpop.f32.mrb[5].mxu1  ;;  %v1106_v46 = vadd.f32 %v3577_v2, %v4929_v20 }
 0x300   : > { %vm1318_vm6 = vcmp.gt.f32.partialorder %v4828_v56, %v1106_v46 }
 0x301   : > { %v3580_v6 = vpop.f32.mrb[6].mxu1 }
 0x302   : > { %v1110_v7 = vpop.f32.mrb[7].mxu1  ;;  %v1116_v2 = vadd.f32 %v3580_v6, %v4929_v20 }
 0x304   : > { %vm1320_vm8 = vcmp.gt.f32.partialorder %v4836_v60, %v1116_v2 }
 0x305   : > { %v4905_v11 = vpop.f32.mrb[8].mxu1 }
 0x306   : > { %v4907_v12 = vpop.f32.mrb[9].mxu1 }
 0x309   : > { %v4909_v13 = vpop.f32.mrb[10].mxu1 }
 0x30a   : > { %v4911_v14 = vpop.f32.mrb[11].mxu1 }
 0x30d   : > { %v4913_v15 = vpop.f32.mrb[12].mxu1 }
 0x30e   : > { %v4915_v16 = vpop.f32.mrb[13].mxu1 }
 0x311   : > { %v4917_v17 = vpop.f32.mrb[14].mxu1 }
 0x312   : > { %v4919_v18 = vpop.f32.mrb[15].mxu1 }
 0x315   : > { %v3597_v21 = vpop.f32.mrb[16].mxu1 }
 0x316   : > { %v1240_v22 = vadd.f32 %v3597_v21, %v4924_v19  ;;  %v1234_v23 = vpop.f32.mrb[17].mxu1 }
 0x317   : > { %v1235_v25 = vadd.f32 %v4924_v19, %v1234_v23 }
 0x318   : > { %v1330_v27 = vmul.f32 %v1240_v22, %v4812_v48 }
 0x319   : > { %v1329_v28 = vmul.f32 %v1235_v25, %v4808_v45  ;;  %v3600_v29 = vpop.f32.mrb[18].mxu1 }
 0x31a   : > { %v1346_v30 = vadd.f32 %v1330_v27, %v1086_v24  ;;  %v1250_v31 = vadd.f32 %v3600_v29, %v4924_v19  ;;  %v1244_v32 = vpop.f32.mrb[19].mxu1 }
 0x31b   : > { %v1345_v34 = vadd.f32 %v1329_v28, %v1081_v26  ;;  %v1245_v35 = vadd.f32 %v4924_v19, %v1244_v32  ;;  %v1126_v28 = vadd.f32 %v4905_v11, %v4929_v20 }
 0x31c   : > { %v1332_v37 = vmul.f32 %v1250_v31, %v4820_v52  ;;  %v1362_v38 = vsel %vm1314_vm2, %v4812_v48, %v1346_v30  ;;  %v1101_v48 = vadd.f32 %v4929_v20, %v1100_v3 }
 0x31d   : > { %v1331_v39 = vmul.f32 %v1245_v35, %v4814_v49  ;;  %v3603_v40 = vpop.f32.mrb[20].mxu1  ;;  %v1361_v41 = vsel %vm1313_vm3, %v4808_v45, %v1345_v34  ;;  %vm1322_vm10 = vcmp.gt.f32.partialorder %v4844_v0, %v1126_v28 }
 0x31e   : > { %v1348_v42 = vadd.f32 %v1332_v37, %v1096_v33  ;;  %v1260_v43 = vadd.f32 %v3603_v40, %v4924_v19  ;;  %v1254_v44 = vpop.f32.mrb[21].mxu1  ;;  %3651 = vmatprep.mubr.f32.mxu0 %v1361_v41  ;;  %vm1317_vm7 = vcmp.gt.f32.partialorder %v4822_v53, %v1101_v48 }
 0x31f   : > { %v1347_v47 = vadd.f32 %v1331_v39, %v1091_v36  ;;  %v1255_v50 = vadd.f32 %v4924_v19, %v1254_v44  ;;  %3652 = vmatmul.mubr.f32.vlgmr.msra.gmra.mrb[16].mxu0 %v1362_v38  ;;  %v1136_v36 = vadd.f32 %v4909_v13, %v4929_v20  ;;  %v1146_v44 = vadd.f32 %v4913_v15, %v4929_v20 }
 0x320   : > { %v1334_v51 = vmul.f32 %v1260_v43, %v4828_v56  ;;  %v1364_v45 = vsel %vm1316_vm4, %v4820_v52, %v1348_v42  ;;  %v1111_v52 = vadd.f32 %v4929_v20, %v1110_v7 }
 0x321   : > { %v1333_v54 = vmul.f32 %v1255_v50, %v4822_v53  ;;  %v3606_v55 = vpop.f32.mrb[22].mxu1  ;;  %v1363_v58 = vsel %vm1315_vm5, %v4814_v49, %v1347_v47  ;;  %vm1324_vm12 = vcmp.gt.f32.partialorder %v4852_v4, %v1136_v36  ;;  %vm1326_vm14 = vcmp.gt.f32.partialorder %v4860_v8, %v1146_v44 }
 0x322   : > { %v1350_v59 = vadd.f32 %v1334_v51, %v1106_v46  ;;  %v1270_v62 = vadd.f32 %v3606_v55, %v4924_v19  ;;  %v1264_v63 = vpop.f32.mrb[23].mxu1  ;;  %3654 = vmatprep.mubr.f32.mxu0 %v1363_v58  ;;  %vm1319_vm9 = vcmp.gt.f32.partialorder %v4830_v57, %v1111_v52  ;;  %v1156_v55 = vadd.f32 %v4917_v17, %v4929_v20 }
 0x323   : > { %v1349_v21 = vadd.f32 %v1333_v54, %v1101_v48  ;;  %v1265_v3 = vadd.f32 %v4924_v19, %v1264_v63  ;;  %3655 = vmatmul.mubr.f32.gmra.mrb[18].mxu0 %v1364_v45 }
 0x324   : > { %v1336_v22 = vmul.f32 %v1270_v62, %v4836_v60  ;;  %v1366_v49 = vsel %vm1318_vm6, %v4828_v56, %v1350_v59  ;;  %v1121_v56 = vadd.f32 %v4929_v20, %v4907_v12  ;;  %vm1328_vm2 = vcmp.gt.f32.partialorder %v4868_v10, %v1156_v55 }
 0x325   : > { %v1335_v23 = vmul.f32 %v1265_v3, %v4830_v57  ;;  %v3609_v24 = vpop.f32.mrb[24].mxu1  ;;  %v1365_v25 = vsel %vm1317_vm7, %v4822_v53, %v1349_v21 }
 0x326   : > { %v1352_v26 = vadd.f32 %v1336_v22, %v1116_v2  ;;  %v1280_v6 = vadd.f32 %v3609_v24, %v4924_v19  ;;  %v1274_v27 = vpop.f32.mrb[25].mxu1  ;;  %3657 = vmatprep.mubr.f32.mxu0 %v1365_v25  ;;  %vm1321_vm11 = vcmp.gt.f32.partialorder %v4838_v61, %v1121_v56 }
 0x327   : > { %v1351_v7 = vadd.f32 %v1335_v23, %v1111_v52  ;;  %v1275_v29 = vadd.f32 %v4924_v19, %v1274_v27  ;;  %3658 = vmatmul.mubr.f32.gmra.mrb[20].mxu0 %v1366_v49 }
 0x328   : > { %v1338_v53 = vmul.f32 %v1280_v6, %v4844_v0  ;;  %v1368_v30 = vsel %vm1320_vm8, %v4836_v60, %v1352_v26  ;;  %v1131_v60 = vadd.f32 %v4929_v20, %v4911_v14 }
 0x329   : > { %v1337_v31 = vmul.f32 %v1275_v29, %v4838_v61  ;;  %v3612_v32 = vpop.f32.mrb[26].mxu1  ;;  %v1367_v33 = vsel %vm1319_vm9, %v4830_v57, %v1351_v7 }
 0x32a   : > { %v1354_v34 = vadd.f32 %v1338_v53, %v1126_v28  ;;  %v1290_v11 = vadd.f32 %v3612_v32, %v4924_v19  ;;  %v1284_v35 = vpop.f32.mrb[27].mxu1  ;;  %3660 = vmatprep.mubr.f32.mxu0 %v1367_v33  ;;  %vm1323_vm13 = vcmp.gt.f32.partialorder %v4846_v1, %v1131_v60  ;;  %v2001_v33 = vld [vmem:[#allocation8] sm:$0xff] }
 0x32b   : > { %v1353_v12 = vadd.f32 %v1337_v31, %v1121_v56  ;;  %v1285_v37 = vadd.f32 %v4924_v19, %v1284_v35  ;;  %3661 = vmatmul.mubr.f32.gmra.mrb[22].mxu0 %v1368_v30 }
 0x32c   : > { %v1340_v57 = vmul.f32 %v1290_v11, %v4852_v4  ;;  %v1370_v38 = vsel %vm1322_vm10, %v4844_v0, %v1354_v34  ;;  %v1141_v0 = vadd.f32 %v4929_v20, %v4915_v16  ;;  %v2002_v34 = vld [vmem:[#allocation8 + $0x8] sm:$0xff] }
 0x32d   : > { %v1339_v39 = vmul.f32 %v1285_v37, %v4846_v1  ;;  %v3615_v40 = vpop.f32.mrb[28].mxu1  ;;  %v1369_v41 = vsel %vm1321_vm11, %v4838_v61, %v1353_v12 }
 0x32e   : > { %v1356_v42 = vadd.f32 %v1340_v57, %v1136_v36  ;;  %v1300_v13 = vadd.f32 %v3615_v40, %v4924_v19  ;;  %v1294_v43 = vpop.f32.mrb[29].mxu1  ;;  %3663 = vmatprep.mubr.f32.mxu0 %v1369_v41  ;;  %vm1325_vm15 = vcmp.gt.f32.partialorder %v4854_v5, %v1141_v0  ;;  %v3955_v36 = vpack.c.bf16 %v2002_v34, %v2001_v33 }
 0x32f   : > { %v1355_v14 = vadd.f32 %v1339_v39, %v1131_v60  ;;  %v1295_v46 = vadd.f32 %v4924_v19, %v1294_v43  ;;  %3664 = vmatmul.mubr.f32.gmra.mrb[24].mxu0 %v1370_v38  ;;  %v2004_v43 = vld [vmem:[#allocation8 + $0x18] sm:$0xff] }
 0x330   : > { %v1342_v61 = vmul.f32 %v1300_v13, %v4860_v8  ;;  %v1372_v47 = vsel %vm1324_vm12, %v4852_v4, %v1356_v42  ;;  %v1151_v4 = vadd.f32 %v4929_v20, %v4919_v18  ;;  %v2003_v13 = vld [vmem:[#allocation8 + $0x10] sm:$0xff] }
 0x331   : > { %v1341_v50 = vmul.f32 %v1295_v46, %v4854_v5  ;;  %v3618_v48 = vpop.f32.mrb[30].mxu1  ;;  %v1371_v51 = vsel %vm1323_vm13, %v4846_v1, %v1355_v14  ;;  %v3959_v46 = vpack.c.bf16 %v2004_v43, %v2003_v13 }
 0x332   : > { %v1358_v45 = vadd.f32 %v1342_v61, %v1146_v44  ;;  %v1310_v15 = vadd.f32 %v3618_v48, %v4924_v19  ;;  %v1304_v54 = vpop.f32.mrb[31].mxu1  ;;  %3666 = vmatprep.mubr.f32.mxu1 %v1371_v51  ;;  %vm1327_vm3 = vcmp.gt.f32.partialorder %v4862_v9, %v1151_v4  ;;  %v2006_v61 = vld [vmem:[#allocation8 + $0x28] sm:$0xff]  ;;  %v2007_v51 = vld [vmem:[#allocation8 + $0x30] sm:$0xff] }
 0x333   : > { %v1357_v16 = vadd.f32 %v1341_v50, %v1141_v0  ;;  %v1305_v58 = vadd.f32 %v4924_v19, %v1304_v54  ;;  %3667 = vmatmul.mubr.f32.vlgmr.msra.gmra.mrb[32].mxu1 %v1372_v47  ;;  %v2005_v0 = vld [vmem:[#allocation8 + $0x20] sm:$0xff] }
 0x334   : > { %v1344_v1 = vmul.f32 %v1310_v15, %v4868_v10  ;;  %v1374_v59 = vsel %vm1326_vm14, %v4860_v8, %v1358_v45  ;;  %v1547_v8 = vld [vmem:[%s5600_s11] sm:$0x3]  ;;  %v3963_v48 = vpack.c.bf16 %v2006_v61, %v2005_v0  ;;  %v2008_v45 = vld [vmem:[#allocation8 + $0x38] sm:$0xff] }
 0x335   : > { %v1343_v62 = vmul.f32 %v1305_v58, %v4862_v9  ;;  %v1373_v63 = vsel %vm1325_vm15, %v4854_v5, %v1357_v16  ;;  %v1545_v5 = vld [vmem:[%s5598_s9] sm:$0x3]  ;;  %3701 = vmatprep.subr.msk.mxu0 %vm1010_vm0, %v1547_v8  ;;  %v2010_v58 = vld [vmem:[#allocation8 + $0x48] sm:$0xff] }
 0x336   : > { %v1360_v2 = vadd.f32 %v1344_v1, %v1156_v55  ;;  %3669 = vmatprep.mubr.f32.mxu1 %v1373_v63  ;;  %3675 = vmatprep.subr.msk.mxu1 %vm1010_vm0, %v1545_v5  ;;  %v3967_v55 = vpack.c.bf16 %v2008_v45, %v2007_v51  ;;  %v2009_v16 = vld [vmem:[#allocation8 + $0x40] sm:$0xff]  ;;  %v2012_v63 = vld [vmem:[#allocation8 + $0x58] sm:$0xff] }
 0x337   : > { %v1359_v17 = vadd.f32 %v1343_v62, %v1151_v4  ;;  %3670 = vmatmul.mubr.f32.gmra.mrb[34].mxu1 %v1374_v59  ;;  %3702 = vmatpush3.msk.msra.mxu0 %vm1010_vm0, %v1547_v8  ;;  %v3971_v59 = vpack.c.bf16 %v2010_v58, %v2009_v16  ;;  %v2011_v62 = vld [vmem:[#allocation8 + $0x50] sm:$0xff] }
 0x338   : > { %v1376_v19 = vsel %vm1328_vm2, %v4868_v10, %v1360_v2  ;;  %3676 = vmatpush3.msk.msra.mxu1 %vm1010_vm0, %v1545_v5 }
 0x339   : > { %v1375_v18 = vsel %vm1327_vm3, %v4862_v9, %v1359_v17  ;;  %v3183_v9 = vld [vmem:[%s5597_s8] ss:$0 sm:$0xff]  ;;  %3956 = vmatprep.subr.bf16.mxu1 %v3955_v36 }
 0x33a   : > { %3672 = vmatprep.mubr.f32.mxu1 %v1375_v18 }
 0x33b   : > { %3673 = vmatmul.mubr.f32.gmra.mrb[36].mxu1 %v1376_v19  ;;  %v3975_v19 = vpack.c.bf16 %v2012_v63, %v2011_v62 }
 0x3f2   : > { %v3653_v10 = vpop.f32.mrb[16].mxu0 }
 0x3f3   : > { %v5032_v20 = vadd.f32 %v3653_v10, %v3183_v9  ;;  %v1466_v21 = vpop.f32.mrb[17].mxu0 }
 0x3f4   : > { %v5034_v3 = vadd.f32 %v3183_v9, %v1466_v21 }
 0x3f5   : > { %1573 = vrot.lane.b32.xlu1 %v5032_v20, %s4419_s18 }
 0x3f6   : > { %v3656_v52 = vpop.f32.mrb[18].mxu0  ;;  %1571 = vrot.lane.b32.xlu0 %v5034_v3, %s4419_s18 }
 0x3f7   : > { %v5040_v22 = vadd.f32 %v3656_v52, %v3183_v9  ;;  %v1476_v49 = vpop.f32.mrb[19].mxu0  ;;  %v2013_v52 = vld [vmem:[#allocation8 + $0x60] sm:$0xff] }
 0x3f8   : > { %v5042_v23 = vadd.f32 %v3183_v9, %v1476_v49  ;;  %v2014_v49 = vld [vmem:[#allocation8 + $0x68] sm:$0xff] }
 0x3f9   : > { %1577 = vrot.lane.b32.xlu1 %v5040_v22, %s4419_s18 }
 0x3fa   : > { %v3659_v24 = vpop.f32.mrb[20].mxu0  ;;  %1575 = vrot.lane.b32.xlu0 %v5042_v23, %s4419_s18 }
 0x3fb   : > { %v5048_v25 = vadd.f32 %v3659_v24, %v3183_v9  ;;  %v1486_v26 = vpop.f32.mrb[21].mxu0  ;;  %v3979_v24 = vpack.c.bf16 %v2014_v49, %v2013_v52 }
 0x3fc   : > { %v5050_v6 = vadd.f32 %v3183_v9, %v1486_v26  ;;  %v2015_v26 = vld [vmem:[#allocation8 + $0x70] sm:$0xff] }
 0x3fd   : > { %1581 = vrot.lane.b32.xlu1 %v5048_v25, %s4419_s18 }
 0x3fe   : > { %v3662_v27 = vpop.f32.mrb[22].mxu0  ;;  %1579 = vrot.lane.b32.xlu0 %v5050_v6, %s4419_s18 }
 0x3ff   : > { %v5056_v28 = vadd.f32 %v3662_v27, %v3183_v9  ;;  %v1496_v7 = vpop.f32.mrb[23].mxu0  ;;  %v2016_v27 = vld [vmem:[#allocation8 + $0x78] sm:$0xff] }
 0x400   : > { %v5058_v29 = vadd.f32 %v3183_v9, %v1496_v7  ;;  %v3983_v7 = vpack.c.bf16 %v2016_v27, %v2015_v26 }
 0x401   : > { %1585 = vrot.lane.b32.xlu1 %v5056_v28, %s4419_s18 }
 0x402   : > { %v3665_v56 = vpop.f32.mrb[24].mxu0  ;;  %1583 = vrot.lane.b32.xlu0 %v5058_v29, %s4419_s18 }
 0x403   : > { %v5064_v53 = vadd.f32 %v3665_v56, %v3183_v9  ;;  %v1506_v30 = vpop.f32.mrb[25].mxu0  ;;  %v5131_v56 = vld [vmem:[%s5601_s12] ss:$0 sm:$0xff] }
 0x404   : > { %v5066_v31 = vadd.f32 %v3183_v9, %v1506_v30  ;;  %v5136_v30 = vld [vmem:[%s5658_s20] ss:$0 sm:$0xff]  ;;  %s5662_s20 = sld [smem:[#allocation29_spill]] }
 0x405   : > { %1589 = vrot.lane.b32.xlu1 %v5064_v53, %s4419_s18 }
 0x406   : > { %v3668_v32 = vpop.f32.mrb[32].mxu1  ;;  %1587 = vrot.lane.b32.xlu0 %v5066_v31, %s4419_s18 }
 0x407   : > { %v5072_v11 = vadd.f32 %v3668_v32, %v3183_v9  ;;  %v1516_v35 = vpop.f32.mrb[33].mxu1 }
 0x408   : > { %v5074_v12 = vadd.f32 %v3183_v9, %v1516_v35 }
 0x409   : > { %1593 = vrot.lane.b32.xlu1 %v5072_v11, %s4419_s18 }
 0x40a   : > { %v3671_v37 = vpop.f32.mrb[34].mxu1  ;;  %1591 = vrot.lane.b32.xlu0 %v5074_v12, %s4419_s18 }
 0x40b   : > { %v5080_v60 = vadd.f32 %v3671_v37, %v3183_v9  ;;  %v1526_v57 = vpop.f32.mrb[35].mxu1 }
 0x40c   : > { %v5082_v38 = vadd.f32 %v3183_v9, %v1526_v57 }
 0x40d   : > { %1597 = vrot.lane.b32.xlu1 %v5080_v60, %s4419_s18 }
 0x40e   : > { %1595 = vrot.lane.b32.xlu0 %v5082_v38, %s4419_s18  ;;  %v3674_v39 = vpop.f32.mrb[36].mxu1 }
 0x40f   : > { %v5088_v40 = vadd.f32 %v3674_v39, %v3183_v9  ;;  %v1536_v41 = vpop.f32.mrb[37].mxu1 }
 0x410   : > { %v5090_v42 = vadd.f32 %v3183_v9, %v1536_v41 }
 0x411   : > { %1601 = vrot.lane.b32.xlu1 %v5088_v40, %s4419_s18 }
 0x412   : > { %1599 = vrot.lane.b32.xlu0 %v5090_v42, %s4419_s18 }
 0x467   : > { %v1574_v44 = vpop.permute.xlu1 %1573 }
 0x468   : > { %v1572_v14 = vpop.permute.xlu0 %1571 }
 0x469   : > { %3677 = vmatprep.mubr.msk.f32.mxu1 %vm977_vm1, %v1572_v14  ;;  %3703 = vmatprep.mubr.msk.f32.mxu0 %vm977_vm1, %v1572_v14 }
 0x46a   : > { %3678 = vmatmul.mubr.msk.f32.vlgmr.msra.gmra.mrb[38].mxu1 %vm977_vm1, %v1574_v44  ;;  %3704 = vmatmul.mubr.msk.f32.vlgmr.msra.gmra.mrb[26].mxu0 %vm977_vm1, %v1574_v44 }
 0x46b   : > { %v1578_v47 = vpop.permute.xlu1 %1577  ;;  %3958 = vmatpush3.bf16.msra.mxu1 %v3955_v36 }
 0x46c   : > { %v1576_v50 = vpop.permute.xlu0 %1575  ;;  %3960 = vmatprep.subr.bf16.mxu1 %v3959_v46 }
 0x46d   : > { %3680 = vmatprep.mubr.msk.f32.mxu1 %vm977_vm1, %v1576_v50  ;;  %3706 = vmatprep.mubr.msk.f32.mxu0 %vm977_vm1, %v1576_v50 }
 0x46e   : > { %3681 = vmatmul.mubr.msk.f32.gmra.mrb[40].mxu1 %vm977_vm1, %v1578_v47  ;;  %3707 = vmatmul.mubr.msk.f32.gmra.mrb[28].mxu0 %vm977_vm1, %v1578_v47 }
 0x46f   : > { %v1582_v15 = vpop.permute.xlu1 %1581  ;;  %3962 = vmatpush3.bf16.msra.mxu1 %v3959_v46 }
 0x470   : > { %v1580_v54 = vpop.permute.xlu0 %1579  ;;  %3964 = vmatprep.subr.bf16.mxu1 %v3963_v48 }
 0x471   : > { %3683 = vmatprep.mubr.msk.f32.mxu1 %vm977_vm1, %v1580_v54  ;;  %3709 = vmatprep.mubr.msk.f32.mxu0 %vm977_vm1, %v1580_v54 }
 0x472   : > { %3684 = vmatmul.mubr.msk.f32.gmra.mrb[42].mxu1 %vm977_vm1, %v1582_v15  ;;  %3710 = vmatmul.mubr.msk.f32.gmra.mrb[30].mxu0 %vm977_vm1, %v1582_v15 }
 0x473   : > { %v1586_v4 = vpop.permute.xlu1 %1585  ;;  %3966 = vmatpush3.bf16.msra.mxu1 %v3963_v48 }
 0x474   : > { %v1584_v1 = vpop.permute.xlu0 %1583  ;;  %3968 = vmatprep.subr.bf16.mxu1 %v3967_v55 }
 0x475   : > { %3686 = vmatprep.mubr.msk.f32.mxu1 %vm977_vm1, %v1584_v1  ;;  %3712 = vmatprep.mubr.msk.f32.mxu0 %vm977_vm1, %v1584_v1 }
 0x476   : > { %3687 = vmatmul.mubr.msk.f32.gmra.mrb[44].mxu1 %vm977_vm1, %v1586_v4  ;;  %3713 = vmatmul.mubr.msk.f32.gmra.mrb[32].mxu0 %vm977_vm1, %v1586_v4 }
 0x477   : > { %v1590_v2 = vpop.permute.xlu1 %1589  ;;  %3970 = vmatpush3.bf16.msra.mxu1 %v3967_v55 }
 0x478   : > { %v1588_v17 = vpop.permute.xlu0 %1587  ;;  %3972 = vmatprep.subr.bf16.mxu1 %v3971_v59 }
 0x479   : > { %3689 = vmatprep.mubr.msk.f32.mxu1 %vm977_vm1, %v1588_v17  ;;  %3715 = vmatprep.mubr.msk.f32.mxu0 %vm977_vm1, %v1588_v17 }
 0x47a   : > { %3690 = vmatmul.mubr.msk.f32.gmra.mrb[46].mxu1 %vm977_vm1, %v1590_v2  ;;  %3716 = vmatmul.mubr.msk.f32.gmra.mrb[34].mxu0 %vm977_vm1, %v1590_v2 }
 0x47b   : > { %v1594_v18 = vpop.permute.xlu1 %1593  ;;  %3974 = vmatpush3.bf16.msra.mxu1 %v3971_v59 }
 0x47c   : > { %v1592_v8 = vpop.permute.xlu0 %1591  ;;  %3976 = vmatprep.subr.bf16.mxu1 %v3975_v19 }
 0x47d   : > { %3692 = vmatprep.mubr.msk.f32.mxu1 %vm977_vm1, %v1592_v8  ;;  %3718 = vmatprep.mubr.msk.f32.mxu0 %vm977_vm1, %v1592_v8 }
 0x47e   : > { %3693 = vmatmul.mubr.msk.f32.gmra.mrb[48].mxu1 %vm977_vm1, %v1594_v18  ;;  %3719 = vmatmul.mubr.msk.f32.gmra.mrb[36].mxu0 %vm977_vm1, %v1594_v18 }
 0x47f   : > { %v1598_v5 = vpop.permute.xlu1 %1597  ;;  %3978 = vmatpush3.bf16.msra.mxu1 %v3975_v19 }
 0x480   : > { %v1596_v9 = vpop.permute.xlu0 %1595  ;;  %3980 = vmatprep.subr.bf16.mxu1 %v3979_v24 }
 0x481   : > { %3695 = vmatprep.mubr.msk.f32.mxu1 %vm977_vm1, %v1596_v9  ;;  %3721 = vmatprep.mubr.msk.f32.mxu0 %vm977_vm1, %v1596_v9 }
 0x482   : > { %3696 = vmatmul.mubr.msk.f32.gmra.mrb[50].mxu1 %vm977_vm1, %v1598_v5  ;;  %3722 = vmatmul.mubr.msk.f32.gmra.mrb[38].mxu0 %vm977_vm1, %v1598_v5 }
 0x483   : > { %v1602_v21 = vpop.permute.xlu1 %1601  ;;  %3982 = vmatpush3.bf16.msra.mxu1 %v3979_v24 }
 0x484   : > { %v1600_v10 = vpop.permute.xlu0 %1599  ;;  %3984 = vmatprep.subr.bf16.mxu1 %v3983_v7 }
 0x485   : > { %3698 = vmatprep.mubr.msk.f32.mxu1 %vm977_vm1, %v1600_v10  ;;  %3724 = vmatprep.mubr.msk.f32.mxu0 %vm977_vm1, %v1600_v10 }
 0x486   : > { %3699 = vmatmul.mubr.msk.f32.gmra.mrb[52].mxu1 %vm977_vm1, %v1602_v21  ;;  %3725 = vmatmul.mubr.msk.f32.gmra.mrb[40].mxu0 %vm977_vm1, %v1602_v21 }
 0x487   : > { %3986 = vmatpush3.bf16.msra.mxu1 %v3983_v7 }
 0x53d   : > { %v3679_v32 = vpop.f32.mrb[38].mxu1  ;;  %v3705_v33 = vpop.f32.mrb[26].mxu0 }
 0x53e   : > { %v1864_v34 = vadd.f32 %v3705_v33, %v5131_v56  ;;  %v1704_v35 = vpop.f32.mrb[39].mxu1  ;;  %v1858_v36 = vpop.f32.mrb[27].mxu0  ;;  %v1710_v37 = vadd.f32 %v3679_v32, %v5136_v30 }
 0x53f   : > { %v1859_v57 = vadd.f32 %v5131_v56, %v1858_v36  ;;  %v1705_v41 = vadd.f32 %v5136_v30, %v1704_v35 }
 0x540   : > { %v1954_v39 = vmul.f32 %v1864_v34, %v5032_v20  ;;  %vm1938_vm4 = vcmp.gt.f32.partialorder %v5032_v20, %v1710_v37 }
 0x541   : > { %v1953_v13 = vmul.f32 %v1859_v57, %v5034_v3  ;;  %v3682_v43 = vpop.f32.mrb[40].mxu1  ;;  %v3708_v44 = vpop.f32.mrb[28].mxu0  ;;  %vm1937_vm5 = vcmp.gt.f32.partialorder %v5034_v3, %v1705_v41 }
 0x542   : > { %v1970_v14 = vadd.f32 %v1954_v39, %v1710_v37  ;;  %v1874_v46 = vadd.f32 %v3708_v44, %v5131_v56  ;;  %v1714_v0 = vpop.f32.mrb[41].mxu1  ;;  %v1868_v61 = vpop.f32.mrb[29].mxu0  ;;  %v1720_v50 = vadd.f32 %v3682_v43, %v5136_v30 }
 0x543   : > { %v1969_v47 = vadd.f32 %v1953_v13, %v1705_v41  ;;  %v1869_v48 = vadd.f32 %v5131_v56, %v1868_v61  ;;  %v1715_v45 = vadd.f32 %v5136_v30, %v1714_v0 }
 0x544   : > { %v1956_v51 = vmul.f32 %v1874_v46, %v5040_v22  ;;  %v1986_v15 = vsel %vm1938_vm4, %v5032_v20, %v1970_v14  ;;  %vm1940_vm6 = vcmp.gt.f32.partialorder %v5040_v22, %v1720_v50 }
 0x545   : > { %v1955_v54 = vmul.f32 %v1869_v48, %v5042_v23  ;;  %v3685_v55 = vpop.f32.mrb[42].mxu1  ;;  %v3711_v16 = vpop.f32.mrb[30].mxu0  ;;  %v1985_v58 = vsel %vm1937_vm5, %v5034_v3, %v1969_v47  ;;  %vm1939_vm7 = vcmp.gt.f32.partialorder %v5042_v23, %v1715_v45 }
 0x546   : > { %v1972_v4 = vadd.f32 %v1956_v51, %v1720_v50  ;;  %v1884_v1 = vadd.f32 %v3711_v16, %v5131_v56  ;;  %v1724_v59 = vpop.f32.mrb[43].mxu1  ;;  %v1878_v62 = vpop.f32.mrb[31].mxu0  ;;  %3759 = vmatprep.mubr.f32.mxu1 %v1985_v58  ;;  %v1730_v2 = vadd.f32 %v3685_v55, %v5136_v30 }
 0x547   : > { %v1971_v63 = vadd.f32 %v1955_v54, %v1715_v45  ;;  %v1879_v17 = vadd.f32 %v5131_v56, %v1878_v62  ;;  %3760 = vmatmul.mubr.f32.vlgmr.msra.gmra.mrb[54].mxu1 %v1986_v15  ;;  %v1725_v3 = vadd.f32 %v5136_v30, %v1724_v59 }
 0x548   : > { %v1958_v20 = vmul.f32 %v1884_v1, %v5048_v25  ;;  %v1988_v19 = vsel %vm1940_vm6, %v5040_v22, %v1972_v4  ;;  %vm1942_vm8 = vcmp.gt.f32.partialorder %v5048_v25, %v1730_v2 }
 0x549   : > { %v1957_v18 = vmul.f32 %v1879_v17, %v5050_v6  ;;  %v3688_v8 = vpop.f32.mrb[44].mxu1  ;;  %v3714_v5 = vpop.f32.mrb[32].mxu0  ;;  %v1987_v9 = vsel %vm1939_vm7, %v5042_v23, %v1971_v63  ;;  %vm1941_vm9 = vcmp.gt.f32.partialorder %v5050_v6, %v1725_v3 }
 0x54a   : > { %v1974_v10 = vadd.f32 %v1958_v20, %v1730_v2  ;;  %v1894_v21 = vadd.f32 %v3714_v5, %v5131_v56  ;;  %v1734_v52 = vpop.f32.mrb[45].mxu1  ;;  %v1888_v49 = vpop.f32.mrb[33].mxu0  ;;  %3762 = vmatprep.mubr.f32.mxu1 %v1987_v9  ;;  %v1740_v26 = vadd.f32 %v3688_v8, %v5136_v30 }
 0x54b   : > { %v1973_v24 = vadd.f32 %v1957_v18, %v1725_v3  ;;  %v1889_v27 = vadd.f32 %v5131_v56, %v1888_v49  ;;  %3763 = vmatmul.mubr.f32.gmra.mrb[56].mxu1 %v1988_v19  ;;  %v1735_v23 = vadd.f32 %v5136_v30, %v1734_v52 }
 0x54c   : > { %v1960_v22 = vmul.f32 %v1894_v21, %v5056_v28  ;;  %v1990_v7 = vsel %vm1942_vm8, %v5048_v25, %v1974_v10  ;;  %vm1944_vm10 = vcmp.gt.f32.partialorder %v5056_v28, %v1740_v26 }
 0x54d   : > { %v1959_v32 = vmul.f32 %v1889_v27, %v5058_v29  ;;  %v3691_v33 = vpop.f32.mrb[46].mxu1  ;;  %v3717_v34 = vpop.f32.mrb[34].mxu0  ;;  %v1989_v35 = vsel %vm1941_vm9, %v5050_v6, %v1973_v24  ;;  %vm1943_vm11 = vcmp.gt.f32.partialorder %v5058_v29, %v1735_v23 }
 0x54e   : > { %v1976_v36 = vadd.f32 %v1960_v22, %v1740_v26  ;;  %v1904_v37 = vadd.f32 %v3717_v34, %v5131_v56  ;;  %v1744_v57 = vpop.f32.mrb[47].mxu1  ;;  %v1898_v39 = vpop.f32.mrb[35].mxu0  ;;  %3765 = vmatprep.mubr.f32.mxu1 %v1989_v35  ;;  %v1750_v13 = vadd.f32 %v3691_v33, %v5136_v30 }
 0x54f   : > { %v1975_v41 = vadd.f32 %v1959_v32, %v1735_v23  ;;  %v1899_v43 = vadd.f32 %v5131_v56, %v1898_v39  ;;  %3766 = vmatmul.mubr.f32.gmra.mrb[58].mxu1 %v1990_v7  ;;  %v1745_v6 = vadd.f32 %v5136_v30, %v1744_v57 }
 0x550   : > { %v1962_v25 = vmul.f32 %v1904_v37, %v5064_v53  ;;  %v1992_v44 = vsel %vm1944_vm10, %v5056_v28, %v1976_v36  ;;  %vm1946_vm12 = vcmp.gt.f32.partialorder %v5064_v53, %v1750_v13 }
 0x551   : > { %v1961_v14 = vmul.f32 %v1899_v43, %v5066_v31  ;;  %v3694_v46 = vpop.f32.mrb[48].mxu1  ;;  %v3720_v0 = vpop.f32.mrb[36].mxu0  ;;  %v1991_v61 = vsel %vm1943_vm11, %v5058_v29, %v1975_v41  ;;  %vm1945_vm13 = vcmp.gt.f32.partialorder %v5066_v31, %v1745_v6 }
 0x552   : > { %v1978_v47 = vadd.f32 %v1962_v25, %v1750_v13  ;;  %v1914_v50 = vadd.f32 %v3720_v0, %v5131_v56  ;;  %v1754_v48 = vpop.f32.mrb[49].mxu1  ;;  %v1908_v51 = vpop.f32.mrb[37].mxu0  ;;  %3768 = vmatprep.mubr.f32.mxu1 %v1991_v61  ;;  %v1760_v15 = vadd.f32 %v3694_v46, %v5136_v30 }
 0x553   : > { %v1977_v45 = vadd.f32 %v1961_v14, %v1745_v6  ;;  %v1909_v54 = vadd.f32 %v5131_v56, %v1908_v51  ;;  %3769 = vmatmul.mubr.f32.gmra.mrb[60].mxu1 %v1992_v44  ;;  %v1755_v29 = vadd.f32 %v5136_v30, %v1754_v48 }
 0x554   : > { %v1964_v28 = vmul.f32 %v1914_v50, %v5072_v11  ;;  %v1994_v55 = vsel %vm1946_vm12, %v5064_v53, %v1978_v47  ;;  %vm1948_vm14 = vcmp.gt.f32.partialorder %v5072_v11, %v1760_v15 }
 0x555   : > { %v1963_v16 = vmul.f32 %v1909_v54, %v5074_v12  ;;  %v3697_v58 = vpop.f32.mrb[50].mxu1  ;;  %v3723_v4 = vpop.f32.mrb[38].mxu0  ;;  %v1993_v1 = vsel %vm1945_vm13, %v5066_v31, %v1977_v45  ;;  %vm1947_vm15 = vcmp.gt.f32.partialorder %v5074_v12, %v1755_v29  ;;  %v2625_v45 = vld [vmem:[#allocation10] sm:$0xff] }
 0x556   : > { %v1980_v59 = vadd.f32 %v1964_v28, %v1760_v15  ;;  %v1924_v62 = vadd.f32 %v3723_v4, %v5131_v56  ;;  %v1764_v63 = vpop.f32.mrb[51].mxu1  ;;  %v1918_v2 = vpop.f32.mrb[39].mxu0  ;;  %3771 = vmatprep.mubr.f32.mxu1 %v1993_v1  ;;  %v1770_v20 = vadd.f32 %v3697_v58, %v5136_v30  ;;  %v2626_v15 = vld [vmem:[#allocation10 + $0x8] sm:$0xff] }
 0x557   : > { %v1979_v17 = vadd.f32 %v1963_v16, %v1755_v29  ;;  %v1919_v3 = vadd.f32 %v5131_v56, %v1918_v2  ;;  %3772 = vmatmul.mubr.f32.gmra.mrb[62].mxu1 %v1994_v55  ;;  %v1765_v31 = vadd.f32 %v5136_v30, %v1764_v63  ;;  %v3987_v29 = vpack.c.bf16 %v2626_v15, %v2625_v45 }
 0x558   : > { %v1966_v53 = vmul.f32 %v1924_v62, %v5080_v60  ;;  %v1996_v19 = vsel %vm1948_vm14, %v5072_v11, %v1980_v59  ;;  %vm1950_vm2 = vcmp.gt.f32.partialorder %v5080_v60, %v1770_v20 }
 0x559   : > { %v1965_v18 = vmul.f32 %v1919_v3, %v5082_v38  ;;  %v3700_v8 = vpop.f32.mrb[52].mxu1  ;;  %v3726_v5 = vpop.f32.mrb[40].mxu0  ;;  %v1995_v9 = vsel %vm1947_vm15, %v5074_v12, %v1979_v17  ;;  %vm1949_vm3 = vcmp.gt.f32.partialorder %v5082_v38, %v1765_v31  ;;  %v2627_v17 = vld [vmem:[#allocation10 + $0x10] sm:$0xff] }
 0x55a   : > { %v1982_v10 = vadd.f32 %v1966_v53, %v1770_v20  ;;  %v1934_v21 = vadd.f32 %v3726_v5, %v5131_v56  ;;  %v1774_v52 = vpop.f32.mrb[53].mxu1  ;;  %v1928_v49 = vpop.f32.mrb[41].mxu0  ;;  %3774 = vmatprep.mubr.f32.mxu1 %v1995_v9  ;;  %v1780_v26 = vadd.f32 %v3700_v8, %v5136_v30  ;;  %v2628_v20 = vld [vmem:[#allocation10 + $0x18] sm:$0xff] }
 0x55b   : > { %v1981_v24 = vadd.f32 %v1965_v18, %v1765_v31  ;;  %v1929_v27 = vadd.f32 %v5131_v56, %v1928_v49  ;;  %3775 = vmatmul.mubr.f32.gmra.mrb[64].mxu1 %v1996_v19  ;;  %v1775_v12 = vadd.f32 %v5136_v30, %v1774_v52  ;;  %v3991_v31 = vpack.c.bf16 %v2628_v20, %v2627_v17  ;;  %v2629_v19 = vld [vmem:[#allocation10 + $0x20] sm:$0xff]  ;;  %v2630_v18 = vld [vmem:[#allocation10 + $0x28] sm:$0xff] }
 0x55c   : > { %v1968_v11 = vmul.f32 %v1934_v21, %v5088_v40  ;;  %v1998_v22 = vsel %vm1950_vm2, %v5080_v60, %v1982_v10  ;;  %vm1952_vm4 = vcmp.gt.f32.partialorder %v5088_v40, %v1780_v26  ;;  %v2171_v60 = vld [vmem:[%s5659_s15] sm:$0x3]  ;;  %v3995_v9 = vpack.c.bf16 %v2630_v18, %v2629_v19  ;;  %v2631_v10 = vld [vmem:[#allocation10 + $0x30] sm:$0xff]  ;;  %v2632_v21 = vld [vmem:[#allocation10 + $0x38] sm:$0xff]  ;;  %s5663_s15 = sld [smem:[#allocation27_spill]] }
 0x55d   : > { %v1967_v23 = vmul.f32 %v1929_v27, %v5090_v42  ;;  %v1997_v7 = vsel %vm1949_vm3, %v5082_v38, %v1981_v24  ;;  %vm1951_vm5 = vcmp.gt.f32.partialorder %v5090_v42, %v1775_v12  ;;  %v2169_v38 = vld [vmem:[%s5660_s16] sm:$0x3]  ;;  %3809 = vmatprep.subr.msk.mxu1 %vm1010_vm0, %v2171_v60  ;;  %v3999_v24 = vpack.c.bf16 %v2632_v21, %v2631_v10  ;;  %v2634_v27 = vld [vmem:[#allocation10 + $0x48] sm:$0xff]  ;;  %s5664_s16 = sld [smem:[#allocation30_spill]] }
 0x55e   : > { %v1984_v32 = vadd.f32 %v1968_v11, %v1780_v26  ;;  %3777 = vmatprep.mubr.f32.mxu1 %v1997_v7  ;;  %3783 = vmatprep.subr.msk.mxu0 %vm1010_vm0, %v2169_v38  ;;  %v2633_v26 = vld [vmem:[#allocation10 + $0x40] sm:$0xff]  ;;  %v2636_v7 = vld [vmem:[#allocation10 + $0x58] sm:$0xff] }
 0x55f   : > { %v1983_v33 = vadd.f32 %v1967_v23, %v1775_v12  ;;  %3778 = vmatmul.mubr.f32.gmra.mrb[66].mxu1 %v1998_v22  ;;  %3784 = vmatpush3.msk.msra.mxu0 %vm1010_vm0, %v2169_v38  ;;  %v4003_v22 = vpack.c.bf16 %v2634_v27, %v2633_v26  ;;  %v2635_v23 = vld [vmem:[#allocation10 + $0x50] sm:$0xff] }
 0x560   : > { %v2000_v56 = vsel %vm1952_vm4, %v5088_v40, %v1984_v32  ;;  %3810 = vmatpush3.msk.msra.mxu1 %vm1010_vm0, %v2171_v60  ;;  %v3220_v40 = vld [vmem:[%s5661_s29] ss:$0 sm:$0xff]  ;;  %3988 = vmatprep.subr.bf16.mxu0 %v3987_v29 }
 0x561   : > { %v1999_v34 = vsel %vm1951_vm5, %v5090_v42, %v1983_v33 }
 0x562   : > { %3780 = vmatprep.mubr.f32.mxu1 %v1999_v34 }
 0x563   : > { %3781 = vmatmul.mubr.f32.gmra.mrb[68].mxu1 %v2000_v56  ;;  %v4007_v56 = vpack.c.bf16 %v2636_v7, %v2635_v23 }
 0x61a   : > { %v3761_v42 = vpop.f32.mrb[54].mxu1 }
 0x61b   : > { %v5231_v30 = vadd.f32 %v3761_v42, %v3220_v40  ;;  %v2090_v35 = vpop.f32.mrb[55].mxu1 }
 0x61c   : > { %v5233_v36 = vadd.f32 %v3220_v40, %v2090_v35 }
 0x61d   : > { %2197 = vrot.lane.b32.xlu1 %v5231_v30, %s4419_s18 }
 0x61e   : > { %v3764_v37 = vpop.f32.mrb[56].mxu1  ;;  %2195 = vrot.lane.b32.xlu0 %v5233_v36, %s4419_s18 }
 0x61f   : > { %v5239_v57 = vadd.f32 %v3764_v37, %v3220_v40  ;;  %v2100_v39 = vpop.f32.mrb[57].mxu1  ;;  %v2637_v37 = vld [vmem:[#allocation10 + $0x60] sm:$0xff] }
 0x620   : > { %v5241_v41 = vadd.f32 %v3220_v40, %v2100_v39  ;;  %v2638_v39 = vld [vmem:[#allocation10 + $0x68] sm:$0xff] }
 0x621   : > { %2201 = vrot.lane.b32.xlu1 %v5239_v57, %s4419_s18 }
 0x622   : > { %v3767_v13 = vpop.f32.mrb[58].mxu1  ;;  %2199 = vrot.lane.b32.xlu0 %v5241_v41, %s4419_s18 }
 0x623   : > { %v5247_v43 = vadd.f32 %v3767_v13, %v3220_v40  ;;  %v2110_v25 = vpop.f32.mrb[59].mxu1  ;;  %v4011_v13 = vpack.c.bf16 %v2638_v39, %v2637_v37 }
 0x624   : > { %v5249_v6 = vadd.f32 %v3220_v40, %v2110_v25  ;;  %v2639_v25 = vld [vmem:[#allocation10 + $0x70] sm:$0xff] }
 0x625   : > { %2205 = vrot.lane.b32.xlu1 %v5247_v43, %s4419_s18 }
 0x626   : > { %v3770_v44 = vpop.f32.mrb[60].mxu1  ;;  %2203 = vrot.lane.b32.xlu0 %v5249_v6, %s4419_s18 }
 0x627   : > { %v5255_v14 = vadd.f32 %v3770_v44, %v3220_v40  ;;  %v2120_v46 = vpop.f32.mrb[61].mxu1  ;;  %v2640_v44 = vld [vmem:[#allocation10 + $0x78] sm:$0xff] }
 0x628   : > { %v5257_v0 = vadd.f32 %v3220_v40, %v2120_v46  ;;  %v4015_v46 = vpack.c.bf16 %v2640_v44, %v2639_v25 }
 0x629   : > { %2209 = vrot.lane.b32.xlu1 %v5255_v14, %s4419_s18 }
 0x62a   : > { %v3773_v61 = vpop.f32.mrb[62].mxu1  ;;  %2207 = vrot.lane.b32.xlu0 %v5257_v0, %s4419_s18 }
 0x62b   : > { %v5263_v47 = vadd.f32 %v3773_v61, %v3220_v40  ;;  %v2130_v50 = vpop.f32.mrb[63].mxu1  ;;  %v5330_v61 = vld [vmem:[%s5662_s20] ss:$0 sm:$0xff]  ;;  %s5537_s20 = scalar_lea.hbm %s5665_s4, %s3280_s1 }
 0x62c   : > { %v5265_v48 = vadd.f32 %v3220_v40, %v2130_v50  ;;  %v5335_v50 = vld [vmem:[%s5663_s15] ss:$0 sm:$0xff]  ;;  %s4340_s15 = sshll.u32 %s4421_s10, 4  ;;  %s4341_s15 = int_to_ptr.vmem [resolvable:$false] %s4340_s15 }
 0x62d   : > { %2213 = vrot.lane.b32.xlu1 %v5263_v47, %s4419_s18  ;;  %s4342_s23 = scalar_lea.vmem %s4341_s15, 4096  ;;  %p4343_p12 = scmp.lt.s32.totalorder %s5539_s22, %s4341_s15 }
 0x62e   : > { %v3776_v51 = vpop.f32.mrb[64].mxu1  ;;  %2211 = vrot.lane.b32.xlu0 %v5265_v48, %s4419_s18  ;;  %p4344_p1 = scmp.lt.s32.totalorder %s4342_s23, %s4336_s28 }
 0x62f   : > { %v5271_v54 = vadd.f32 %v3776_v51, %v3220_v40  ;;  %v2140_v28 = vpop.f32.mrb[65].mxu1 }
 0x630   : > { %v5273_v55 = vadd.f32 %v3220_v40, %v2140_v28  ;;  %p4345_p2 = por %p4344_p1, %p4343_p12 }
 0x631   : > { %2217 = vrot.lane.b32.xlu1 %v5271_v54, %s4419_s18 }
 0x632   : > { %v3779_v16 = vpop.f32.mrb[66].mxu1  ;;  %2215 = vrot.lane.b32.xlu0 %v5273_v55, %s4419_s18  ;;  %p4346_p13 = pnand %p4345_p2, %p4339_p7 }
 0x633   : > { %v5279_v58 = vadd.f32 %v3779_v16, %v3220_v40  ;;  %v2150_v4 = vpop.f32.mrb[67].mxu1 }
 0x634   : > { %v5281_v1 = vadd.f32 %v3220_v40, %v2150_v4 }
 0x635   : > { %2221 = vrot.lane.b32.xlu1 %v5279_v58, %s4419_s18 }
 0x636   : > { %2219 = vrot.lane.b32.xlu0 %v5281_v1, %s4419_s18  ;;  %v3782_v59 = vpop.f32.mrb[68].mxu1 }
 0x637   : > { %v5287_v62 = vadd.f32 %v3782_v59, %v3220_v40  ;;  %v2160_v63 = vpop.f32.mrb[69].mxu1 }
 0x638   : > { %v5289_v2 = vadd.f32 %v3220_v40, %v2160_v63 }
 0x639   : > { %2225 = vrot.lane.b32.xlu1 %v5287_v62, %s4419_s18 }
 0x63a   : > { %2223 = vrot.lane.b32.xlu0 %v5289_v2, %s4419_s18 }
 0x68f   : > { %v2198_v3 = vpop.permute.xlu1 %2197 }
 0x690   : > { %v2196_v53 = vpop.permute.xlu0 %2195 }
 0x691   : > { %3785 = vmatprep.mubr.msk.f32.mxu0 %vm977_vm1, %v2196_v53  ;;  %3811 = vmatprep.mubr.msk.f32.mxu1 %vm977_vm1, %v2196_v53 }
 0x692   : > { %3786 = vmatmul.mubr.msk.f32.vlgmr.msra.gmra.mrb[42].mxu0 %vm977_vm1, %v2198_v3  ;;  %3812 = vmatmul.mubr.msk.f32.vlgmr.msra.gmra.mrb[70].mxu1 %vm977_vm1, %v2198_v3 }
 0x693   : > { %v2202_v8 = vpop.permute.xlu1 %2201  ;;  %3990 = vmatpush3.bf16.msra.mxu0 %v3987_v29 }
 0x694   : > { %v2200_v5 = vpop.permute.xlu0 %2199  ;;  %3992 = vmatprep.subr.bf16.mxu0 %v3991_v31 }
 0x695   : > { %3788 = vmatprep.mubr.msk.f32.mxu0 %vm977_vm1, %v2200_v5  ;;  %3814 = vmatprep.mubr.msk.f32.mxu1 %vm977_vm1, %v2200_v5 }
 0x696   : > { %3789 = vmatmul.mubr.msk.f32.gmra.mrb[44].mxu0 %vm977_vm1, %v2202_v8  ;;  %3815 = vmatmul.mubr.msk.f32.gmra.mrb[72].mxu1 %vm977_vm1, %v2202_v8 }
 0x697   : > { %v2206_v52 = vpop.permute.xlu1 %2205  ;;  %3994 = vmatpush3.bf16.msra.mxu0 %v3991_v31 }
 0x698   : > { %v2204_v49 = vpop.permute.xlu0 %2203  ;;  %3996 = vmatprep.subr.bf16.mxu0 %v3995_v9 }
 0x699   : > { %3791 = vmatprep.mubr.msk.f32.mxu0 %vm977_vm1, %v2204_v49  ;;  %3817 = vmatprep.mubr.msk.f32.mxu1 %vm977_vm1, %v2204_v49 }
 0x69a   : > { %3792 = vmatmul.mubr.msk.f32.gmra.mrb[46].mxu0 %vm977_vm1, %v2206_v52  ;;  %3818 = vmatmul.mubr.msk.f32.gmra.mrb[74].mxu1 %vm977_vm1, %v2206_v52 }
 0x69b   : > { %v2210_v11 = vpop.permute.xlu1 %2209  ;;  %3998 = vmatpush3.bf16.msra.mxu0 %v3995_v9 }
 0x69c   : > { %v2208_v12 = vpop.permute.xlu0 %2207  ;;  %4000 = vmatprep.subr.bf16.mxu0 %v3999_v24 }
 0x69d   : > { %3794 = vmatprep.mubr.msk.f32.mxu0 %vm977_vm1, %v2208_v12  ;;  %3820 = vmatprep.mubr.msk.f32.mxu1 %vm977_vm1, %v2208_v12 }
 0x69e   : > { %3795 = vmatmul.mubr.msk.f32.gmra.mrb[48].mxu0 %vm977_vm1, %v2210_v11  ;;  %3821 = vmatmul.mubr.msk.f32.gmra.mrb[76].mxu1 %vm977_vm1, %v2210_v11 }
 0x69f   : > { %v2214_v32 = vpop.permute.xlu1 %2213  ;;  %4002 = vmatpush3.bf16.msra.mxu0 %v3999_v24 }
 0x6a0   : > { %v2212_v33 = vpop.permute.xlu0 %2211  ;;  %4004 = vmatprep.subr.bf16.mxu0 %v4003_v22 }
 0x6a1   : > { %3797 = vmatprep.mubr.msk.f32.mxu0 %vm977_vm1, %v2212_v33  ;;  %3823 = vmatprep.mubr.msk.f32.mxu1 %vm977_vm1, %v2212_v33 }
 0x6a2   : > { %3798 = vmatmul.mubr.msk.f32.gmra.mrb[50].mxu0 %vm977_vm1, %v2214_v32  ;;  %3824 = vmatmul.mubr.msk.f32.gmra.mrb[78].mxu1 %vm977_vm1, %v2214_v32 }
 0x6a3   : > { %v2218_v34 = vpop.permute.xlu1 %2217  ;;  %4006 = vmatpush3.bf16.msra.mxu0 %v4003_v22 }
 0x6a4   : > { %v2216_v60 = vpop.permute.xlu0 %2215  ;;  %4008 = vmatprep.subr.bf16.mxu0 %v4007_v56 }
 0x6a5   : > { %3800 = vmatprep.mubr.msk.f32.mxu0 %vm977_vm1, %v2216_v60  ;;  %3826 = vmatprep.mubr.msk.f32.mxu1 %vm977_vm1, %v2216_v60 }
 0x6a6   : > { %3801 = vmatmul.mubr.msk.f32.gmra.mrb[52].mxu0 %vm977_vm1, %v2218_v34  ;;  %3827 = vmatmul.mubr.msk.f32.gmra.mrb[80].mxu1 %vm977_vm1, %v2218_v34 }
 0x6a7   : > { %v2222_v38 = vpop.permute.xlu1 %2221  ;;  %4010 = vmatpush3.bf16.msra.mxu0 %v4007_v56 }
 0x6a8   : > { %v2220_v40 = vpop.permute.xlu0 %2219  ;;  %4012 = vmatprep.subr.bf16.mxu0 %v4011_v13 }
 0x6a9   : > { %3803 = vmatprep.mubr.msk.f32.mxu0 %vm977_vm1, %v2220_v40  ;;  %3829 = vmatprep.mubr.msk.f32.mxu1 %vm977_vm1, %v2220_v40 }
 0x6aa   : > { %3804 = vmatmul.mubr.msk.f32.gmra.mrb[54].mxu0 %vm977_vm1, %v2222_v38  ;;  %3830 = vmatmul.mubr.msk.f32.gmra.mrb[82].mxu1 %vm977_vm1, %v2222_v38 }
 0x6ab   : > { %v2226_v35 = vpop.permute.xlu1 %2225  ;;  %4014 = vmatpush3.bf16.msra.mxu0 %v4011_v13 }
 0x6ac   : > { %v2224_v42 = vpop.permute.xlu0 %2223  ;;  %4016 = vmatprep.subr.bf16.mxu0 %v4015_v46 }
 0x6ad   : > { %3806 = vmatprep.mubr.msk.f32.mxu0 %vm977_vm1, %v2224_v42  ;;  %3832 = vmatprep.mubr.msk.f32.mxu1 %vm977_vm1, %v2224_v42 }
 0x6ae   : > { %3807 = vmatmul.mubr.msk.f32.gmra.mrb[56].mxu0 %vm977_vm1, %v2226_v35  ;;  %3833 = vmatmul.mubr.msk.f32.gmra.mrb[84].mxu1 %vm977_vm1, %v2226_v35 }
 0x6af   : > { %4018 = vmatpush3.bf16.msra.mxu0 %v4015_v46 }
 0x765   : > { %v3787_v51 = vpop.f32.mrb[42].mxu0  ;;  %v3813_v45 = vpop.f32.mrb[70].mxu1 }
 0x766   : > { %v2488_v15 = vadd.f32 %v3813_v45, %v5330_v61  ;;  %v2328_v28 = vpop.f32.mrb[43].mxu0  ;;  %v2482_v29 = vpop.f32.mrb[71].mxu1  ;;  %v2334_v16 = vadd.f32 %v3787_v51, %v5335_v50 }
 0x767   : > { %v2483_v4 = vadd.f32 %v5330_v61, %v2482_v29  ;;  %v2329_v63 = vadd.f32 %v5335_v50, %v2328_v28 }
 0x768   : > { %v2578_v59 = vmul.f32 %v2488_v15, %v5231_v30  ;;  %vm2562_vm0 = vcmp.gt.f32.partialorder %v5231_v30, %v2334_v16 }
 0x769   : > { %v2577_v17 = vmul.f32 %v2483_v4, %v5233_v36  ;;  %v3790_v20 = vpop.f32.mrb[44].mxu0  ;;  %v3816_v3 = vpop.f32.mrb[72].mxu1  ;;  %vm2561_vm1 = vcmp.gt.f32.partialorder %v5233_v36, %v2329_v63 }
 0x76a   : > { %v2594_v53 = vadd.f32 %v2578_v59, %v2334_v16  ;;  %v2498_v31 = vadd.f32 %v3816_v3, %v5330_v61  ;;  %v2338_v19 = vpop.f32.mrb[45].mxu0  ;;  %v2492_v18 = vpop.f32.mrb[73].mxu1  ;;  %v2344_v5 = vadd.f32 %v3790_v20, %v5335_v50 }
 0x76b   : > { %v2593_v8 = vadd.f32 %v2577_v17, %v2329_v63  ;;  %v2493_v9 = vadd.f32 %v5330_v61, %v2492_v18  ;;  %v2339_v21 = vadd.f32 %v5335_v50, %v2338_v19 }
 0x76c   : > { %v2580_v10 = vmul.f32 %v2498_v31, %v5239_v57  ;;  %v2610_v52 = vsel %vm2562_vm0, %v5231_v30, %v2594_v53  ;;  %vm2564_vm6 = vcmp.gt.f32.partialorder %v5239_v57, %v2344_v5 }
 0x76d   : > { %v2579_v49 = vmul.f32 %v2493_v9, %v5241_v41  ;;  %v3793_v24 = vpop.f32.mrb[46].mxu0  ;;  %v3819_v26 = vpop.f32.mrb[74].mxu1  ;;  %v2609_v27 = vsel %vm2561_vm1, %v5233_v36, %v2593_v8  ;;  %vm2563_vm7 = vcmp.gt.f32.partialorder %v5241_v41, %v2339_v21 }
 0x76e   : > { %v2596_v11 = vadd.f32 %v2580_v10, %v2344_v5  ;;  %v2508_v12 = vadd.f32 %v3819_v26, %v5330_v61  ;;  %v2348_v22 = vpop.f32.mrb[47].mxu0  ;;  %v2502_v23 = vpop.f32.mrb[75].mxu1  ;;  %3867 = vmatprep.mubr.f32.mxu0 %v2609_v27  ;;  %v2354_v32 = vadd.f32 %v3793_v24, %v5335_v50 }
 0x76f   : > { %v2595_v7 = vadd.f32 %v2579_v49, %v2339_v21  ;;  %v2503_v33 = vadd.f32 %v5330_v61, %v2502_v23  ;;  %3868 = vmatmul.mubr.f32.vlgmr.msra.gmra.mrb[58].mxu0 %v2610_v52  ;;  %v2349_v36 = vadd.f32 %v5335_v50, %v2348_v22 }
 0x770   : > { %v2582_v30 = vmul.f32 %v2508_v12, %v5247_v43  ;;  %v2612_v56 = vsel %vm2564_vm6, %v5239_v57, %v2596_v11  ;;  %vm2566_vm8 = vcmp.gt.f32.partialorder %v5247_v43, %v2354_v32 }
 0x771   : > { %v2581_v34 = vmul.f32 %v2503_v33, %v5249_v6  ;;  %v3796_v60 = vpop.f32.mrb[48].mxu0  ;;  %v3822_v38 = vpop.f32.mrb[76].mxu1  ;;  %v2611_v40 = vsel %vm2563_vm7, %v5241_v41, %v2595_v7  ;;  %vm2565_vm9 = vcmp.gt.f32.partialorder %v5249_v6, %v2349_v36 }
 0x772   : > { %v2598_v42 = vadd.f32 %v2582_v30, %v2354_v32  ;;  %v2518_v35 = vadd.f32 %v3822_v38, %v5330_v61  ;;  %v2358_v37 = vpop.f32.mrb[49].mxu0  ;;  %v2512_v39 = vpop.f32.mrb[77].mxu1  ;;  %3870 = vmatprep.mubr.f32.mxu0 %v2611_v40  ;;  %v2364_v25 = vadd.f32 %v3796_v60, %v5335_v50 }
 0x773   : > { %v2597_v13 = vadd.f32 %v2581_v34, %v2349_v36  ;;  %v2513_v44 = vadd.f32 %v5330_v61, %v2512_v39  ;;  %3871 = vmatmul.mubr.f32.gmra.mrb[60].mxu0 %v2612_v56  ;;  %v2359_v41 = vadd.f32 %v5335_v50, %v2358_v37 }
 0x774   : > { %v2584_v57 = vmul.f32 %v2518_v35, %v5255_v14  ;;  %v2614_v46 = vsel %vm2566_vm8, %v5247_v43, %v2598_v42  ;;  %vm2568_vm10 = vcmp.gt.f32.partialorder %v5255_v14, %v2364_v25 }
 0x775   : > { %v2583_v51 = vmul.f32 %v2513_v44, %v5257_v0  ;;  %v3799_v45 = vpop.f32.mrb[50].mxu0  ;;  %v3825_v15 = vpop.f32.mrb[78].mxu1  ;;  %v2613_v28 = vsel %vm2565_vm9, %v5249_v6, %v2597_v13  ;;  %vm2567_vm11 = vcmp.gt.f32.partialorder %v5257_v0, %v2359_v41 }
 0x776   : > { %v2600_v29 = vadd.f32 %v2584_v57, %v2364_v25  ;;  %v2528_v16 = vadd.f32 %v3825_v15, %v5330_v61  ;;  %v2368_v4 = vpop.f32.mrb[51].mxu0  ;;  %v2522_v59 = vpop.f32.mrb[79].mxu1  ;;  %3873 = vmatprep.mubr.f32.mxu0 %v2613_v28  ;;  %v2374_v17 = vadd.f32 %v3799_v45, %v5335_v50 }
 0x777   : > { %v2599_v63 = vadd.f32 %v2583_v51, %v2359_v41  ;;  %v2523_v20 = vadd.f32 %v5330_v61, %v2522_v59  ;;  %3874 = vmatmul.mubr.f32.gmra.mrb[62].mxu0 %v2614_v46  ;;  %v2369_v6 = vadd.f32 %v5335_v50, %v2368_v4 }
 0x778   : > { %v2586_v43 = vmul.f32 %v2528_v16, %v5263_v47  ;;  %v2616_v3 = vsel %vm2568_vm10, %v5255_v14, %v2600_v29  ;;  %vm2570_vm12 = vcmp.gt.f32.partialorder %v5263_v47, %v2374_v17 }
 0x779   : > { %v2585_v53 = vmul.f32 %v2523_v20, %v5265_v48  ;;  %v3802_v31 = vpop.f32.mrb[52].mxu0  ;;  %v3828_v19 = vpop.f32.mrb[80].mxu1  ;;  %v2615_v18 = vsel %vm2567_vm11, %v5257_v0, %v2599_v63  ;;  %vm2569_vm13 = vcmp.gt.f32.partialorder %v5265_v48, %v2369_v6 }
 0x77a   : > { %v2602_v8 = vadd.f32 %v2586_v43, %v2374_v17  ;;  %v2538_v5 = vadd.f32 %v3828_v19, %v5330_v61  ;;  %v2378_v9 = vpop.f32.mrb[53].mxu0  ;;  %v2532_v10 = vpop.f32.mrb[81].mxu1  ;;  %3876 = vmatprep.mubr.f32.mxu0 %v2615_v18  ;;  %v2384_v52 = vadd.f32 %v3802_v31, %v5335_v50 }
 0x77b   : > { %v2601_v21 = vadd.f32 %v2585_v53, %v2369_v6  ;;  %v2533_v49 = vadd.f32 %v5330_v61, %v2532_v10  ;;  %3877 = vmatmul.mubr.f32.gmra.mrb[64].mxu0 %v2616_v3  ;;  %v2379_v0 = vadd.f32 %v5335_v50, %v2378_v9 }
 0x77c   : > { %v2588_v14 = vmul.f32 %v2538_v5, %v5271_v54  ;;  %v2618_v24 = vsel %vm2570_vm12, %v5263_v47, %v2602_v8  ;;  %vm2572_vm14 = vcmp.gt.f32.partialorder %v5271_v54, %v2384_v52 }
 0x77d   : > { %v2587_v26 = vmul.f32 %v2533_v49, %v5273_v55  ;;  %v3805_v27 = vpop.f32.mrb[54].mxu0  ;;  %v3831_v11 = vpop.f32.mrb[82].mxu1  ;;  %v2617_v12 = vsel %vm2569_vm13, %v5265_v48, %v2601_v21  ;;  %vm2571_vm15 = vcmp.gt.f32.partialorder %v5273_v55, %v2379_v0 }
 0x77e   : > { %v2604_v22 = vadd.f32 %v2588_v14, %v2384_v52  ;;  %v2548_v23 = vadd.f32 %v3831_v11, %v5330_v61  ;;  %v2388_v7 = vpop.f32.mrb[55].mxu0  ;;  %v2542_v32 = vpop.f32.mrb[83].mxu1  ;;  %3879 = vmatprep.mubr.f32.mxu0 %v2617_v12  ;;  %v2394_v30 = vadd.f32 %v3805_v27, %v5335_v50 }
 0x77f   : > { %v2603_v33 = vadd.f32 %v2587_v26, %v2379_v0  ;;  %v2543_v36 = vadd.f32 %v5330_v61, %v2542_v32  ;;  %3880 = vmatmul.mubr.f32.gmra.mrb[66].mxu0 %v2618_v24  ;;  %v2389_v48 = vadd.f32 %v5335_v50, %v2388_v7 }
 0x780   : > { %v2590_v47 = vmul.f32 %v2548_v23, %v5279_v58  ;;  %v2620_v56 = vsel %vm2572_vm14, %v5271_v54, %v2604_v22  ;;  %vm2574_vm2 = vcmp.gt.f32.partialorder %v5279_v58, %v2394_v30 }
 0x781   : > { %v2589_v34 = vmul.f32 %v2543_v36, %v5281_v1  ;;  %v3808_v60 = vpop.f32.mrb[56].mxu0  ;;  %v3834_v38 = vpop.f32.mrb[84].mxu1  ;;  %v2619_v40 = vsel %vm2571_vm15, %v5273_v55, %v2603_v33  ;;  %vm2573_vm3 = vcmp.gt.f32.partialorder %v5281_v1, %v2389_v48 }
 0x782   : > { %v2606_v42 = vadd.f32 %v2590_v47, %v2394_v30  ;;  %v2558_v35 = vadd.f32 %v3834_v38, %v5330_v61  ;;  %v2398_v37 = vpop.f32.mrb[57].mxu0  ;;  %v2552_v39 = vpop.f32.mrb[85].mxu1  ;;  %3882 = vmatprep.mubr.f32.mxu0 %v2619_v40  ;;  %v2404_v25 = vadd.f32 %v3808_v60, %v5335_v50 }
 0x783   : > { %v2605_v13 = vadd.f32 %v2589_v34, %v2389_v48  ;;  %v2553_v44 = vadd.f32 %v5330_v61, %v2552_v39  ;;  %3883 = vmatmul.mubr.f32.gmra.mrb[68].mxu0 %v2620_v56  ;;  %v2399_v55 = vadd.f32 %v5335_v50, %v2398_v37  ;;  %v4420_v50 = vmov 29  }
 0x784   : > { %v2592_v54 = vmul.f32 %v2558_v35, %v5287_v62  ;;  %v2622_v57 = vsel %vm2574_vm2, %v5279_v58, %v2606_v42  ;;  %vm2576_vm4 = vcmp.gt.f32.partialorder %v5287_v62, %v2404_v25  ;;  %4128 = vset.pattern.permute.xlu1 %v4420_v50  ;;  %4129 = vset.pattern.permute.xlu0 %v4420_v50  ;;  %v5420_v58 = vld [vmem:[%s5664_s16] ss:$0 sm:$0xff] }
 0x785   : > { %v2591_v41 = vmul.f32 %v2553_v44, %v5289_v2  ;;  %v2621_v46 = vsel %vm2573_vm3, %v5281_v1, %v2605_v13  ;;  %vm2575_vm5 = vcmp.gt.f32.partialorder %v5289_v2, %v2399_v55 }
 0x786   : > { %v2608_v51 = vadd.f32 %v2592_v54, %v2404_v25  ;;  %3885 = vmatprep.mubr.f32.mxu0 %v2621_v46 }
 0x787   : > { %v2607_v45 = vadd.f32 %v2591_v41, %v2399_v55  ;;  %3886 = vmatmul.mubr.f32.gmra.mrb[70].mxu0 %v2622_v57 }
 0x788   : > { %v2624_v61 = vsel %vm2576_vm4, %v5287_v62, %v2608_v51 }
 0x789   : > { %v2623_v15 = vsel %vm2575_vm5, %v5289_v2, %v2607_v45 }
 0x78a   : > { %3888 = vmatprep.mubr.f32.mxu0 %v2623_v15 }
 0x78b   : > { %3889 = vmatmul.mubr.f32.gmra.mrb[72].mxu0 %v2624_v61 }
 0x842   : > { %v3869_v1 = vpop.f32.mrb[58].mxu0 }
 0x843   : > { %v5423_v28 = vadd.f32 %v3869_v1, %v5420_v58  ;;  %v2714_v29 = vpop.f32.mrb[59].mxu0 }
 0x844   : > { %v5426_v16 = vadd.f32 %v5420_v58, %v2714_v29 }
 0x845   : > { %v3259_v62 = vmul.f32 -1.442695, %v5423_v28 }
 0x846   : > { %v3258_v2 = vmul.f32 -1.442695, %v5426_v16  ;;  %v3872_v4 = vpop.f32.mrb[60].mxu0 }
 0x847   : > { %4130 = vpow2.f32 %v3259_v62  ;;  %v5431_v59 = vadd.f32 %v3872_v4, %v5420_v58  ;;  %v2724_v63 = vpop.f32.mrb[61].mxu0 }
 0x848   : > { %4132 = vpow2.f32 %v3258_v2  ;;  %v5434_v17 = vadd.f32 %v5420_v58, %v2724_v63 }
 0x849   : > { %v3261_v20 = vmul.f32 -1.442695, %v5431_v59 }
 0x84a   : > { %v3260_v43 = vmul.f32 -1.442695, %v5434_v17  ;;  %v3875_v6 = vpop.f32.mrb[62].mxu0 }
 0x84b   : > { %4134 = vpow2.f32 %v3261_v20  ;;  %v5439_v3 = vadd.f32 %v3875_v6, %v5420_v58  ;;  %v2734_v53 = vpop.f32.mrb[63].mxu0 }
 0x84c   : > { %4136 = vpow2.f32 %v3260_v43  ;;  %v5442_v31 = vadd.f32 %v5420_v58, %v2734_v53 }
 0x84d   : > { %v3263_v19 = vmul.f32 -1.442695, %v5439_v3 }
 0x84e   : > { %v3262_v18 = vmul.f32 -1.442695, %v5442_v31  ;;  %v3878_v8 = vpop.f32.mrb[64].mxu0 }
 0x84f   : > { %4138 = vpow2.f32 %v3263_v19  ;;  %v5447_v5 = vadd.f32 %v3878_v8, %v5420_v58  ;;  %v2744_v9 = vpop.f32.mrb[65].mxu0 }
 0x850   : > { %4140 = vpow2.f32 %v3262_v18  ;;  %v5450_v10 = vadd.f32 %v5420_v58, %v2744_v9 }
 0x851   : > { %v4131_v21 = vpop.eup %4130  ;;  %v3265_v52 = vmul.f32 -1.442695, %v5447_v5 }
 0x852   : > { %v4133_v49 = vpop.eup %4132  ;;  %v2842_v14 = vadd.f32 1.0, %v4131_v21  ;;  %v3264_v0 = vmul.f32 -1.442695, %v5450_v10  ;;  %v3881_v24 = vpop.f32.mrb[66].mxu0 }
 0x853   : > { %v2841_v26 = vadd.f32 1.0, %v4133_v49  ;;  %4142 = vpow2.f32 %v3265_v52  ;;  %v5455_v27 = vadd.f32 %v3881_v24, %v5420_v58  ;;  %v2754_v11 = vpop.f32.mrb[67].mxu0 }
 0x854   : > { %4144 = vrcp.f32 %v2842_v14  ;;  %v5458_v12 = vadd.f32 %v5420_v58, %v2754_v11 }
 0x855   : > { %v4135_v22 = vpop.eup %4134  ;;  %4146 = vrcp.f32 %v2841_v26  ;;  %v3267_v23 = vmul.f32 -1.442695, %v5455_v27 }
 0x856   : > { %v4137_v7 = vpop.eup %4136  ;;  %v2844_v32 = vadd.f32 1.0, %v4135_v22  ;;  %4148 = vpow2.f32 %v3264_v0  ;;  %v3266_v33 = vmul.f32 -1.442695, %v5458_v12  ;;  %v3884_v30 = vpop.f32.mrb[68].mxu0 }
 0x857   : > { %v2843_v36 = vadd.f32 1.0, %v4137_v7  ;;  %4150 = vpow2.f32 %v3267_v23  ;;  %v5463_v47 = vadd.f32 %v3884_v30, %v5420_v58  ;;  %v2764_v48 = vpop.f32.mrb[69].mxu0 }
 0x858   : > { %4152 = vrcp.f32 %v2844_v32  ;;  %v5466_v56 = vadd.f32 %v5420_v58, %v2764_v48 }
 0x859   : > { %v4139_v34 = vpop.eup %4138  ;;  %4154 = vrcp.f32 %v2843_v36  ;;  %v3269_v60 = vmul.f32 -1.442695, %v5463_v47 }
 0x85a   : > { %v4141_v38 = vpop.eup %4140  ;;  %v2846_v40 = vadd.f32 1.0, %v4139_v34  ;;  %4156 = vpow2.f32 %v3266_v33  ;;  %v3268_v42 = vmul.f32 -1.442695, %v5466_v56  ;;  %v3887_v35 = vpop.f32.mrb[70].mxu0 }
 0x85b   : > { %v2845_v37 = vadd.f32 1.0, %v4141_v38  ;;  %4158 = vpow2.f32 %v3269_v60  ;;  %v5471_v39 = vadd.f32 %v3887_v35, %v5420_v58  ;;  %v2774_v13 = vpop.f32.mrb[71].mxu0  ;;  %v2889_v38 = vlaneseq }
 0x85c   : > { %4160 = vrcp.f32 %v2846_v40  ;;  %v5474_v25 = vadd.f32 %v5420_v58, %v2774_v13 }
 0x85d   : > { %v4143_v44 = vpop.eup %4142  ;;  %4162 = vrcp.f32 %v2845_v37  ;;  %v3271_v54 = vmul.f32 -1.442695, %v5471_v39  ;;  %v2890_v40 = vand.u32 127, %v2889_v38 }
 0x85e   : > { %v4145_v55 = vpop.eup %4144  ;;  %v2848_v57 = vadd.f32 1.0, %v4143_v44  ;;  %4164 = vpow2.f32 %v3268_v42  ;;  %v3270_v41 = vmul.f32 -1.442695, %v5474_v25  ;;  %v3890_v46 = vpop.f32.mrb[72].mxu0 }
 0x85f   : > { %v4147_v51 = vpop.eup %4146  ;;  %4166 = vpow2.f32 %v3271_v54  ;;  %v5479_v45 = vadd.f32 %v3890_v46, %v5420_v58  ;;  %2899 = vperm.xlu1 %4128, %v4145_v55   ;;  %v2784_v61 = vpop.f32.mrb[73].mxu0  ;;  %vm2891_vm0 = vcmp.eq.s32.totalorder %v2890_v40, 30 }
 0x860   : > { %v4149_v15 = vpop.eup %4148  ;;  %4168 = vrcp.f32 %v2848_v57  ;;  %v5482_v50 = vadd.f32 %v5420_v58, %v2784_v61  ;;  %2894 = vperm.xlu0 %4129, %v4147_v51  }
 0x861   : > { %v4151_v1 = vpop.eup %4150  ;;  %v2847_v29 = vadd.f32 1.0, %v4149_v15  ;;  %4170 = vpow2.f32 %v3270_v41  ;;  %v3273_v62 = vmul.f32 -1.442695, %v5479_v45 }
 0x862   : > { %v4153_v2 = vpop.eup %4152  ;;  %v2850_v4 = vadd.f32 1.0, %v4151_v1  ;;  %v3272_v63 = vmul.f32 -1.442695, %v5482_v50 }
 0x863   : > { %v4155_v20 = vpop.eup %4154  ;;  %4172 = vrcp.f32 %v2847_v29 }
 0x864   : > { %v4157_v43 = vpop.eup %4156  ;;  %4174 = vrcp.f32 %v2850_v4  ;;  %2904 = vperm.xlu1 %4128, %v4155_v20   ;;  %2909 = vperm.xlu0 %4129, %v4153_v2  }
 0x865   : > { %v4159_v6 = vpop.eup %4158  ;;  %v2849_v53 = vadd.f32 1.0, %v4157_v43  ;;  %4176 = vpow2.f32 %v3273_v62 }
 0x866   : > { %v4161_v58 = vpop.eup %4160  ;;  %v2852_v19 = vadd.f32 1.0, %v4159_v6  ;;  %4178 = vpow2.f32 %v3272_v63 }
 0x867   : > { %v4163_v18 = vpop.eup %4162  ;;  %4180 = vrcp.f32 %v2849_v53 }
 0x868   : > { %v4165_v8 = vpop.eup %4164  ;;  %4182 = vrcp.f32 %v2852_v19  ;;  %2914 = vperm.xlu1 %4128, %v4163_v18   ;;  %2919 = vperm.xlu0 %4129, %v4161_v58  }
 0x869   : > { %v4167_v9 = vpop.eup %4166  ;;  %v2851_v21 = vadd.f32 1.0, %v4165_v8 }
 0x86a   : > { %v4169_v52 = vpop.eup %4168  ;;  %v2854_v49 = vadd.f32 1.0, %v4167_v9 }
 0x86b   : > { %v4171_v14 = vpop.eup %4170  ;;  %4184 = vrcp.f32 %v2851_v21 }
 0x86c   : > { %4186 = vrcp.f32 %v2854_v49  ;;  %v2853_v0 = vadd.f32 1.0, %v4171_v14  ;;  %2929 = vperm.xlu0 %4129, %v4169_v52  }
 0x86d   : > { %v4173_v24 = vpop.eup %4172 }
 0x86e   : > { %v4175_v26 = vpop.eup %4174  ;;  %4188 = vrcp.f32 %v2853_v0  ;;  %2924 = vperm.xlu1 %4128, %v4173_v24  }
 0x86f   : > { %v4177_v11 = vpop.eup %4176 }
 0x870   : > { %v4179_v22 = vpop.eup %4178  ;;  %v2856_v23 = vadd.f32 1.0, %v4177_v11  ;;  %2939 = vperm.xlu0 %4129, %v4175_v26  }
 0x871   : > { %v4181_v7 = vpop.eup %4180  ;;  %v2855_v32 = vadd.f32 1.0, %v4179_v22 }
 0x872   : > { %v4183_v33 = vpop.eup %4182  ;;  %4190 = vrcp.f32 %v2856_v23  ;;  %2934 = vperm.xlu1 %4128, %v4181_v7  }
 0x873   : > { %4192 = vrcp.f32 %v2855_v32 }
 0x874   : > { %2949 = vperm.xlu0 %4129, %v4183_v33  }
 0x875   : > { %v4185_v30 = vpop.eup %4184 }
 0x876   : > { %v4187_v36 = vpop.eup %4186  ;;  %2944 = vperm.xlu1 %4128, %v4185_v30  }
 0x878   : > { %v4189_v48 = vpop.eup %4188  ;;  %2959 = vperm.xlu0 %4129, %v4187_v36  }
 0x87a   : > { %2954 = vperm.xlu1 %4128, %v4189_v48  }
 0x87c   : > { %v4191_v34 = vpop.eup %4190 }
 0x87d   : > { %v4193_v60 = vpop.eup %4192  ;;  %2969 = vperm.xlu0 %4129, %v4191_v34  }
 0x87e   : > { %2964 = vperm.xlu1 %4128, %v4193_v60  }
 0x8de   : > { %v2900_v42 = vpop.permute.xlu1 %2899 }
 0x8df   : > { %v2973_v35 = vsel %vm2891_vm0, %v2900_v42, %v5423_v28  ;;  %v2895_v37 = vpop.permute.xlu0 %2894 }
 0x8e0   : > { %2989 = vst [vmem:[%s5490_s30 + $0x8] sm:$0xff] %v2973_v35  ;;  %v2972_v13 = vsel %vm2891_vm0, %v2895_v37, %v5426_v16 }
 0x8e1   : > { %2988 = vst [vmem:[%s5490_s30] sm:$0xff] %v2972_v13 }
 0x8e3   : > { %v2905_v44 = vpop.permute.xlu1 %2904  ;;  %v2910_v54 = vpop.permute.xlu0 %2909 }
 0x8e4   : > { %v2974_v28 = vsel %vm2891_vm0, %v2905_v44, %v5434_v17  ;;  %v2975_v55 = vsel %vm2891_vm0, %v2910_v54, %v5431_v59 }
 0x8e5   : > { %2990 = vst [vmem:[%s5490_s30 + $0x10] sm:$0xff] %v2974_v28  ;;  %2991 = vst [vmem:[%s5490_s30 + $0x18] sm:$0xff] %v2975_v55 }
 0x8e7   : > { %v2915_v57 = vpop.permute.xlu1 %2914  ;;  %v2920_v41 = vpop.permute.xlu0 %2919 }
 0x8e8   : > { %v2976_v16 = vsel %vm2891_vm0, %v2915_v57, %v5442_v31  ;;  %v2977_v46 = vsel %vm2891_vm0, %v2920_v41, %v5439_v3 }
 0x8e9   : > { %2992 = vst [vmem:[%s5490_s30 + $0x20] sm:$0xff] %v2976_v16  ;;  %2993 = vst [vmem:[%s5490_s30 + $0x28] sm:$0xff] %v2977_v46 }
 0x8eb   : > { %v2930_v51 = vpop.permute.xlu0 %2929 }
 0x8ec   : > { %v2979_v17 = vsel %vm2891_vm0, %v2930_v51, %v5447_v5 }
 0x8ed   : > { %v2925_v59 = vpop.permute.xlu1 %2924  ;;  %2995 = vst [vmem:[%s5490_s30 + $0x38] sm:$0xff] %v2979_v17 }
 0x8ee   : > { %v2978_v61 = vsel %vm2891_vm0, %v2925_v59, %v5450_v10 }
 0x8ef   : > { %2994 = vst [vmem:[%s5490_s30 + $0x30] sm:$0xff] %v2978_v61  ;;  %v2940_v15 = vpop.permute.xlu0 %2939 }
 0x8f0   : > { %v2981_v3 = vsel %vm2891_vm0, %v2940_v15, %v5455_v27 }
 0x8f1   : > { %v2935_v31 = vpop.permute.xlu1 %2934  ;;  %2997 = vst [vmem:[%s5490_s30 + $0x48] sm:$0xff] %v2981_v3 }
 0x8f2   : > { %v2980_v5 = vsel %vm2891_vm0, %v2935_v31, %v5458_v12 }
 0x8f3   : > { %2996 = vst [vmem:[%s5490_s30 + $0x40] sm:$0xff] %v2980_v5  ;;  %v2950_v1 = vpop.permute.xlu0 %2949 }
 0x8f4   : > { %v2983_v29 = vsel %vm2891_vm0, %v2950_v1, %v5463_v47 }
 0x8f5   : > { %v2945_v10 = vpop.permute.xlu1 %2944  ;;  %2999 = vst [vmem:[%s5490_s30 + $0x58] sm:$0xff] %v2983_v29 }
 0x8f6   : > { %v2982_v62 = vsel %vm2891_vm0, %v2945_v10, %v5466_v56 }
 0x8f7   : > { %2998 = vst [vmem:[%s5490_s30 + $0x50] sm:$0xff] %v2982_v62  ;;  %v2960_v27 = vpop.permute.xlu0 %2959 }
 0x8f8   : > { %v2985_v2 = vsel %vm2891_vm0, %v2960_v27, %v5471_v39 }
 0x8f9   : > { %v2955_v4 = vpop.permute.xlu1 %2954  ;;  %3001 = vst [vmem:[%s5490_s30 + $0x68] sm:$0xff] %v2985_v2 }
 0x8fa   : > { %v2984_v12 = vsel %vm2891_vm0, %v2955_v4, %v5474_v25 }
 0x8fb   : > { %3000 = vst [vmem:[%s5490_s30 + $0x60] sm:$0xff] %v2984_v12 }
 0x8fc   : > { %v2970_v47 = vpop.permute.xlu0 %2969 }
 0x8fd   : > { %v2987_v56 = vsel %vm2891_vm0, %v2970_v47, %v5479_v45  ;;  %v2965_v39 = vpop.permute.xlu1 %2964 }
 0x8fe   : > { %3003 = vst [vmem:[%s5490_s30 + $0x78] sm:$0xff] %v2987_v56  ;;  %v2986_v25 = vsel %vm2891_vm0, %v2965_v39, %v5482_v50 }
 0x8ff   : > { %3002 = vst [vmem:[%s5490_s30 + $0x70] sm:$0xff] %v2986_v25 }
 0x900   : > { %4349 = shalt.err (!%p4346_p13)
}
 0x901   : > { %s4350_s17 = scalar_lea.hbm %s5537_s20, 2048  ;;  %s4354_s1 = scalar_lea.hbm %s5665_s4, 4096 }
 0x902   : > { %p4351_p9 = scmp.ne.s32.totalorder %s5537_s20, %s4350_s17  ;;  %p4355_p4 = scmp.lt.u32.totalorder %s5537_s20, %s5665_s4 }
 0x903   : > { %p4356_p8 = scmp.lt.u32.totalorder %s4354_s1, %s4350_s17  ;;  %p4358_p3 = scmp.lt.u32.totalorder %s4350_s17, %s5537_s20 }
 0x904   : > { %p4352_p0 = pnand %p4351_p9, %p4705_p10 }
 0x905   : > { %p4357_p6 = por %p4356_p8, %p4355_p4 }
 0x906   : > { %p4353_p11 = pneg %p4352_p0 }
 0x907   : > { %p4359_p5 = por %p4358_p3, %p4357_p6 }
 0x909   : > { %p4360_p7 = pnand %p4359_p5, %p4353_p11 }
 0x90b   : > { %4363 = shalt.err (!%p4360_p7)
}
 0x90c   : > { %s4422_s28 = smov 128   ;;  %s4423_s10 = smov 8  }
 0x90d   : > { %4053 = dma.vmem_to_hbm [thread:$0]  (%p4705_p10), %s5539_s22, 2048, %s5537_s20, %s3005_s3, %s4422_s28, %s4422_s28, %s4423_s10  }
 0x90e PF: > { %s5666_s15 = sld [smem:[#allocation16_spill]]  ;;  %s5667_s23 = sld [smem:[#allocation17_spill]] }
 0x90f   : > { %p5669_p1 = scmp.ge.s32.totalorder %s4410_s27, 2 }
 0x914   : > { %s3033_s16 = sand.u32 1, %s5666_s15   ;;  %p5668_p12 = scmp.ne.s32.totalorder %s5667_s23, 0 }
 0x915   : > { %s3034_s17 = scalar_lea.sflag [#allocation4], %s3033_s16 }
 0x916   : > { %p4073_p2 = pnand %p5669_p1, %p5668_p12 }
 0x918   : > { %4393 = dma.done.wait (!%p4073_p2), %s3034_s17, 2048  }
 0x919   : > { %4395 = vsyncadd (!%p4073_p2), %s3034_s17, 4294965248  ;;  %p36_p13 = scmp.ge.s32.totalorder %s4695_s14, 4   ;;  %s5670_s2 = smov %s4402_s25 }
 0x91a   : > { %s5671_s25 = smov %s4406_s26  ;;  %s5672_s26 = smov %s4711_s0 }
 0x91b   : > { %s5673_s27 = smov %s4695_s14  ;;  %38 = sbr.rel (!%p36_p13) target bundleno = 22 (0x16), region = 165 }
 0x922   :  { %3039 = vsyncpa [#allocation3], 1 }
 0x923   :  { %3041 = vsyncpa [#allocation3 + $0x1], 1 }
 0x924   :  { %3042 = vsyncpa [#allocation6], 1 }
 0x925   :  { %3043 = vsyncpa [#allocation9], 1 }
 0x926   :  { %3044 = vsyncpa [#allocation4], 1 }
 0x927   :  { %3046 = vsyncpa [#allocation4 + $0x1], 1 }

</bundles_post_ra>
